<compile_context>
chip_gen: v7x
topology: tpu7x:2x2x1
jax: 0.10.0
libtpu: 0.0.40
codegen_flags: <defaults>
</compile_context>

<pallas_src>
import math
import functools

import numpy as np
import jax
import jax.numpy as jnp
from jax import lax
from jax.experimental import pallas as pl
from jax.experimental.pallas import tpu as pltpu


# ----------------------------------------------------------------------------
# Fused encoder kernel.
# Grid = (batch_blocks, layers).  One grid step = one layer applied to one
# block of whole batch rows; the activation stays resident in a VMEM scratch
# across the layer axis, while that layer's weights stream in per step.
# ----------------------------------------------------------------------------

def fused_encoder_kernel(e_ref, pe_ref, bias_ref,
                         wqkv_ref, bqkv_ref, wo_ref, bo_ref,
                         ln1g_ref, ln1b_ref,
                         w1_ref, b1_ref, w2_ref, b2_ref,
                         ln2g_ref, ln2b_ref,
                         o_ref, x_scratch, *, scale, num_heads):
    l = pl.program_id(1)
    num_layers = pl.num_programs(1)
    bblk, S, D = e_ref.shape
    N = bblk * S
    H = num_heads
    dh = D // H
    K = w1_ref.shape[1]
    pad = (K - 1) // 2
    inv_sqrt_dh = 1.0 / math.sqrt(dh)
    cdt = wqkv_ref.dtype              # MXU operand dtype (bf16 in production)

    # ---- at layer 0: build the resident activation x = emb*sqrt(D) + PE ----
    @pl.when(l == 0)
    def _():
        x0 = e_ref[...] * scale + pe_ref[...][None]          # (Bblk, S, D) f32
        x_scratch[...] = x0.reshape(N, D)

    xf = x_scratch[...]                                      # (N, D) f32
    key_bias = bias_ref[...]                                 # (Bblk, 1, S) f32

    def layer_norm(z, g, b):
        mu = jnp.mean(z, axis=-1, keepdims=True)
        var = jnp.mean(jnp.square(z - mu), axis=-1, keepdims=True)
        return (z - mu) * lax.rsqrt(var + 1e-5) * g + b      # rsqrt -> EUP

    # conv tap boundary masks from iota (rows whose shifted source crosses a
    # sequence boundary are zeroed) -- a few VPU compares, no HBM input.
    pos = lax.broadcasted_iota(jnp.int32, (N, 1), 0) % S
    tap_masks = [((pos + (j - pad) >= 0) & (pos + (j - pad) < S)
                  ).astype(jnp.float32) for j in range(K)]

    def conv1d_same(inp, w_l, b_l):
        # 'same' Conv1d over the sequence axis as K shifted matmuls; shifts via
        # XLU sublane roll + boundary masks (no pad/concatenate copies).
        acc = jnp.dot(inp.astype(cdt), w_l[pad],
                      preferred_element_type=jnp.float32)
        for j in range(K):
            off = j - pad
            if off == 0:
                continue
            rolled = pltpu.roll(inp, shift=(-off) % N, axis=0)   # f32 roll
            shifted = (rolled * tap_masks[j]).astype(cdt)
            acc = acc + jnp.dot(shifted, w_l[j],
                                preferred_element_type=jnp.float32)
        return acc + b_l

    # ------------------ multi-head self-attention ---------------------------
    xb = xf.astype(cdt)
    qkv = jnp.dot(xb, wqkv_ref[0], preferred_element_type=jnp.float32)
    qkv = qkv + bqkv_ref[0]                                  # (N, 3D) f32
    q = qkv[:, 0 * D:1 * D].reshape(bblk, S, D)
    k = qkv[:, 1 * D:2 * D].reshape(bblk, S, D)
    v = qkv[:, 2 * D:3 * D].reshape(bblk, S, D)

    ctx_heads = []
    for h in range(H):                                       # static head loop
        sl = slice(h * dh, (h + 1) * dh)
        qh = q[:, :, sl].astype(cdt)
        kh = k[:, :, sl].astype(cdt)
        vh = v[:, :, sl].astype(cdt)
        sc = jnp.einsum("bqd,bkd->bqk", qh, kh,
                        preferred_element_type=jnp.float32) * inv_sqrt_dh
        sc = sc + key_bias                                   # mask padded keys
        sc = sc - jnp.max(sc, axis=-1, keepdims=True)
        p = jnp.exp(sc)
        p = p / jnp.sum(p, axis=-1, keepdims=True)           # exact softmax
        ctx_heads.append(jnp.einsum("bqk,bkd->bqd", p.astype(cdt), vh,
                                    preferred_element_type=jnp.float32))
    ctx = jnp.concatenate(ctx_heads, axis=-1).reshape(N, D)  # lane concat
    attn = jnp.dot(ctx.astype(cdt), wo_ref[0],
                   preferred_element_type=jnp.float32) + bo_ref[0]
    xf = layer_norm(xf + attn, ln1g_ref[0], ln1b_ref[0])     # post-LN

    # ------------------ convolution feed-forward ----------------------------
    hmid = jnp.maximum(conv1d_same(xf, w1_ref[0], b1_ref[0]), 0.0)
    ff = conv1d_same(hmid, w2_ref[0], b2_ref[0])
    xf = layer_norm(xf + ff, ln2g_ref[0], ln2b_ref[0])

    x_scratch[...] = xf                                      # carry to layer l+1

    @pl.when(l == num_layers - 1)
    def _():
        o_ref[...] = xf.reshape(bblk, S, D)                  # single final store


# ----------------------------------------------------------------------------
# pallas_call wrapper
# ----------------------------------------------------------------------------

def encoder_pallas(e, pe, bias, sw, *, scale, num_heads, block_b=None):
    B, S, D = e.shape
    if block_b is None:
        block_b = max(1, B // 2)      # nb >= 2: v7x's 2 TCs / DMA-compute pipeline
    assert B % block_b == 0
    nb = B // block_b
    L = sw["wqkv"].shape[0]
    K = sw["w1"].shape[1]
    F = sw["w1"].shape[-1]
    N = block_b * S
    dh = D // num_heads

    def wspec(arr):                   # stream one layer's slice per grid step
        nd = arr.ndim
        return pl.BlockSpec((1,) + arr.shape[1:],
                            lambda b, l, _nd=nd: (l,) + (0,) * (_nd - 1))

    weight_names = ["wqkv", "bqkv", "wo", "bo", "ln1_g", "ln1_b",
                    "w1", "b1", "w2", "b2", "ln2_g", "ln2_b"]
    weights = [sw[n] for n in weight_names]

    flops = int(nb * L * (2 * N * D * 3 * D                          # fused QKV
                          + block_b * num_heads * 4 * S * S * dh     # scores+ctx
                          + 2 * N * D * D                            # out proj
                          + 4 * K * N * D * F))                      # two convs
    transcendentals = int(nb * L * block_b * num_heads * S * S)
    bytes_accessed = int(4 * (2 * e.size + pe.size + bias.size)
                         + nb * sum(int(w.size) * w.dtype.itemsize
                                    for w in weights))

    return pl.pallas_call(
        functools.partial(fused_encoder_kernel, scale=scale,
                          num_heads=num_heads),
        out_shape=jax.ShapeDtypeStruct((B, S, D), jnp.float32),
        grid=(nb, L),                               # batch blocks x layers
        in_specs=[
            pl.BlockSpec((block_b, S, D), lambda b, l: (b, 0, 0)),   # embeddings
            pl.BlockSpec((S, D), lambda b, l: (0, 0)),               # pos. enc.
            pl.BlockSpec((block_b, 1, S), lambda b, l: (b, 0, 0)),   # key bias
        ] + [wspec(w) for w in weights],
        out_specs=pl.BlockSpec((block_b, S, D), lambda b, l: (b, 0, 0)),
        scratch_shapes=[pltpu.VMEM((N, D), jnp.float32)],    # resident activation
        compiler_params=pltpu.CompilerParams(
            dimension_semantics=("parallel", "arbitrary"),
            vmem_limit_bytes=64 * 1024 * 1024),
        cost_estimate=pl.CostEstimate(flops=flops,
                                      transcendentals=transcendentals,
                                      bytes_accessed=bytes_accessed),
    )(e, pe, bias, *weights)


# ----------------------------------------------------------------------------
# Parameter init (deterministic, synthetic), host-side weight stacking, forward
# ----------------------------------------------------------------------------

def sinusoidal_pe(S, D):
    pe = np.zeros((S, D), np.float32)
    pos = np.arange(S, dtype=np.float32)[:, None]
    div = np.exp(np.arange(0, D, 2, dtype=np.float32) * (-math.log(10000.0) / D))
    pe[:, 0::2] = np.sin(pos * div)
    pe[:, 1::2] = np.cos(pos * div)
    return jnp.asarray(pe)


def init_params(key, vocab_size, d_model, d_ff, num_layers, kernel_size,
                pad_token_id, seq_len):
    keys = iter(jax.random.split(key, 8 + 16 * num_layers))

    def nrm(shape, s=0.1):
        return (s * jax.random.normal(next(keys), shape)).astype(jnp.float32)

    emb = nrm((vocab_size, d_model))
    emb = emb.at[pad_token_id].set(0.0)        # padding_idx row is zero
    params = {"emb": emb, "pe": sinusoidal_pe(seq_len, d_model), "layers": []}
    for _ in range(num_layers):
        layer = {
            "wq": nrm((d_model, d_model)), "bq": nrm((1, d_model), 0.01),
            "wk": nrm((d_model, d_model)), "bk": nrm((1, d_model), 0.01),
            "wv": nrm((d_model, d_model)), "bv": nrm((1, d_model), 0.01),
            "wo": nrm((d_model, d_model)), "bo": nrm((1, d_model), 0.01),
            "ln1_g": 1.0 + nrm((1, d_model), 0.05), "ln1_b": nrm((1, d_model), 0.01),
            "w1": nrm((kernel_size, d_model, d_ff)), "b1": nrm((1, d_ff), 0.01),
            "w2": nrm((kernel_size, d_ff, d_model)), "b2": nrm((1, d_model), 0.01),
            "ln2_g": 1.0 + nrm((1, d_model), 0.05), "ln2_b": nrm((1, d_model), 0.01),
        }
        params["layers"].append(layer)
    return params


def stack_for_pallas(params, matmul_dtype=jnp.bfloat16):
    """Stack per-layer weights with a leading layer axis (for layer streaming)
    and fuse Q/K/V.  MXU weights are cast to `matmul_dtype` (bf16 = native MXU
    dtype, halves weight DMA/VMEM); biases and LayerNorm params stay f32."""
    def stk(name):
        return jnp.stack([lw[name] for lw in params["layers"]], 0)

    wqkv = jnp.stack([jnp.concatenate([lw["wq"], lw["wk"], lw["wv"]], axis=1)
                      for lw in params["layers"]], 0)           # (L, D, 3D)
    bqkv = jnp.stack([jnp.concatenate([lw["bq"], lw["bk"], lw["bv"]], axis=1)
                      for lw in params["layers"]], 0)           # (L, 1, 3D)
    return {
        "wqkv": wqkv.astype(matmul_dtype), "bqkv": bqkv,
        "wo": stk("wo").astype(matmul_dtype), "bo": stk("bo"),
        "ln1_g": stk("ln1_g"), "ln1_b": stk("ln1_b"),
        "w1": stk("w1").astype(matmul_dtype), "b1": stk("b1"),
        "w2": stk("w2").astype(matmul_dtype), "b2": stk("b2"),
        "ln2_g": stk("ln2_g"), "ln2_b": stk("ln2_b"),
    }


def fastspeech2_encoder_forward(params, stacked, tokens, mask, *, num_heads,
                                block_b=None):
    d_model = params["emb"].shape[1]
    scale = math.sqrt(d_model)
    # glue: embedding gather in plain JAX (data-dependent gather)
    e = jnp.take(params["emb"], tokens, axis=0).astype(jnp.float32)   # (B,S,D)
    # hoisted additive key-mask bias (0 = valid key, -1e9 = padded key)
    bias = (1.0 - mask.astype(jnp.float32))[:, None, :] * (-1e9)      # (B,1,S)
    return encoder_pallas(e, params["pe"], bias, stacked, scale=scale,
                          num_heads=num_heads, block_b=block_b)


# ----------------------------------------------------------------------------
# Pure-JAX reference (same math).  matmul_dtype controls the MXU-operand cast
# so the bf16 kernel path can be checked tightly against matching reference math.
# ----------------------------------------------------------------------------

def reference_forward(params, tokens, mask, *, num_heads, kernel_size,
                      matmul_dtype=jnp.float32):
    mmdt = matmul_dtype
    d_model = params["emb"].shape[1]
    scale = math.sqrt(d_model)
    x = jnp.take(params["emb"], tokens, axis=0).astype(jnp.float32)
    x = x * scale + params["pe"][None]
    m = mask.astype(jnp.float32)[:, None, :]                           # (B,1,S)
    B, S, D = x.shape
    dh = D // num_heads
    pad = (kernel_size - 1) // 2

    def mm(eq, a, b):    # matmul with operands cast to mmdt, f32 accumulation
        return jnp.einsum(eq, a.astype(mmdt), b.astype(mmdt),
                          preferred_element_type=jnp.float32)

    def ln(z, g, b):
        mu = jnp.mean(z, axis=-1, keepdims=True)
        var = jnp.mean((z - mu) ** 2, axis=-1, keepdims=True)
        return ((z - mu) / jnp.sqrt(var + 1e-5)) * g + b

    def conv1d(inp, w, b):        # inp (B,S,Cin), w (K,Cin,Cout)
        xp = jnp.pad(inp, ((0, 0), (pad, pad), (0, 0)))
        acc = sum(mm("bsi,io->bso", xp[:, j:j + S, :], w[j])
                  for j in range(kernel_size))
        return acc + b

    for lw in params["layers"]:
        q = mm("bsi,io->bso", x, lw["wq"]) + lw["bq"]
        k = mm("bsi,io->bso", x, lw["wk"]) + lw["bk"]
        v = mm("bsi,io->bso", x, lw["wv"]) + lw["bv"]
        heads = []
        for h in range(num_heads):
            sl = slice(h * dh, (h + 1) * dh)
            sc = mm("bqd,bkd->bqk", q[:, :, sl], k[:, :, sl]) / math.sqrt(dh)
            sc = jnp.where(m > 0.5, sc, -1e9)
            sc = sc - jnp.max(sc, axis=-1, keepdims=True)
            p = jnp.exp(sc)
            p = p / jnp.sum(p, axis=-1, keepdims=True)
            heads.append(mm("bqk,bkd->bqd", p, v[:, :, sl]))
        attn = mm("bsi,io->bso", jnp.concatenate(heads, axis=-1),
                  lw["wo"]) + lw["bo"]
        x = ln(x + attn, lw["ln1_g"], lw["ln1_b"])
        hmid = jnp.maximum(conv1d(x, lw["w1"], lw["b1"]), 0.0)
        ff = conv1d(hmid, lw["w2"], lw["b2"])
        x = ln(x + ff, lw["ln2_g"], lw["ln2_b"])
    return x


# ----------------------------------------------------------------------------

if __name__ == "__main__":
    # small, module-consistent shapes
    # TODO(synk): realistic FastSpeech2 configs should use D_MODEL / D_FF / d_head
    #   as multiples of 128 for lane-dense vregs and unmasked stores.
    VOCAB, D_MODEL, D_FF = 50, 32, 64
    NUM_LAYERS, NUM_HEADS, KERNEL_SIZE = 2, 2, 3
    PAD_ID = 0
    B, S = 2, 8

    root = jax.random.PRNGKey(0)
    k_par, k_tok = jax.random.split(root)

    params = init_params(k_par, VOCAB, D_MODEL, D_FF, NUM_LAYERS, KERNEL_SIZE,
                         PAD_ID, S)

    tokens = jax.random.randint(k_tok, (B, S), 1, VOCAB, dtype=jnp.int32)
    lengths = jnp.array([S, S - 2], dtype=jnp.int32)
    mask = (jnp.arange(S)[None, :] < lengths[:, None]).astype(jnp.int32)   # (B,S)
    tokens = tokens * mask + PAD_ID * (1 - mask)

    # Production config: bf16 MXU operands, f32 accumulation / statistics.
    stacked = stack_for_pallas(params, matmul_dtype=jnp.bfloat16)
    out = fastspeech2_encoder_forward(params, stacked, tokens, mask,
                                      num_heads=NUM_HEADS)
    out = jax.block_until_ready(out)
    assert out.shape == (B, S, D_MODEL), out.shape
    assert bool(jnp.all(jnp.isfinite(out)))

    # Tight structural check: reference using the same bf16 MXU-operand math.
    ref_bf16 = reference_forward(params, tokens, mask, num_heads=NUM_HEADS,
                                 kernel_size=KERNEL_SIZE,
                                 matmul_dtype=jnp.bfloat16)
    ref_bf16 = jax.block_until_ready(ref_bf16)
    np.testing.assert_allclose(np.asarray(out), np.asarray(ref_bf16),
                               rtol=2e-3, atol=2e-3)

    # Parity check vs. the exact f32 reference (loose tol covers bf16 operand
    # rounding accumulated across both layers).
    with jax.default_matmul_precision("highest"):
        ref_f32 = reference_forward(params, tokens, mask, num_heads=NUM_HEADS,
                                    kernel_size=KERNEL_SIZE,
                                    matmul_dtype=jnp.float32)
    ref_f32 = jax.block_until_ready(ref_f32)
    np.testing.assert_allclose(np.asarray(out), np.asarray(ref_f32),
                               rtol=1e-1, atol=1e-1)

    print("KERNEL_OK")
</pallas_src>

<mosaic_0001>
module attributes {stable_mosaic.version = 11 : i64} {
  func.func @fused_encoder_kernel(%arg0: i32, %arg1: i32, %arg2: memref<1x8x32xf32, #tpu.memory_space<vmem>>, %arg3: memref<8x32xf32, #tpu.memory_space<vmem>>, %arg4: memref<1x1x8xf32, #tpu.memory_space<vmem>>, %arg5: memref<1x32x96xbf16, #tpu.memory_space<vmem>>, %arg6: memref<1x1x96xf32, #tpu.memory_space<vmem>>, %arg7: memref<1x32x32xbf16, #tpu.memory_space<vmem>>, %arg8: memref<1x1x32xf32, #tpu.memory_space<vmem>>, %arg9: memref<1x1x32xf32, #tpu.memory_space<vmem>>, %arg10: memref<1x1x32xf32, #tpu.memory_space<vmem>>, %arg11: memref<1x3x32x64xbf16, #tpu.memory_space<vmem>>, %arg12: memref<1x1x64xf32, #tpu.memory_space<vmem>>, %arg13: memref<1x3x64x32xbf16, #tpu.memory_space<vmem>>, %arg14: memref<1x1x32xf32, #tpu.memory_space<vmem>>, %arg15: memref<1x1x32xf32, #tpu.memory_space<vmem>>, %arg16: memref<1x1x32xf32, #tpu.memory_space<vmem>>, %arg17: memref<1x8x32xf32, #tpu.memory_space<vmem>>, %arg18: memref<8x32xf32, #tpu.memory_space<vmem>>) attributes {dimension_semantics = [#tpu.dimension_semantics<parallel>, #tpu.dimension_semantics<arbitrary>], iteration_bounds = array<i64: 2, 2>, scalar_prefetch = 0 : i64, scratch_operands = 1 : i64, tpu.core_type = #tpu.core_type<tc>, window_params = [{transform_indices = @transform_0, window_bounds = array<i64: 1, 8, 32>}, {pipeline_mode = #tpu.pipeline_mode<synchronous>, transform_indices = @transform_1, window_bounds = array<i64: 8, 32>}, {transform_indices = @transform_2, window_bounds = array<i64: 1, 1, 8>}, {transform_indices = @transform_3, window_bounds = array<i64: 1, 32, 96>}, {transform_indices = @transform_4, window_bounds = array<i64: 1, 1, 96>}, {transform_indices = @transform_5, window_bounds = array<i64: 1, 32, 32>}, {transform_indices = @transform_6, window_bounds = array<i64: 1, 1, 32>}, {transform_indices = @transform_7, window_bounds = array<i64: 1, 1, 32>}, {transform_indices = @transform_8, window_bounds = array<i64: 1, 1, 32>}, {transform_indices = @transform_9, window_bounds = array<i64: 1, 3, 32, 64>}, {transform_indices = @transform_10, window_bounds = array<i64: 1, 1, 64>}, {transform_indices = @transform_11, window_bounds = array<i64: 1, 3, 64, 32>}, {transform_indices = @transform_12, window_bounds = array<i64: 1, 1, 32>}, {transform_indices = @transform_13, window_bounds = array<i64: 1, 1, 32>}, {transform_indices = @transform_14, window_bounds = array<i64: 1, 1, 32>}, {transform_indices = @transform_15, window_bounds = array<i64: 1, 8, 32>}]} {
    %c0_i32 = arith.constant 0 : i32
    %0 = arith.cmpi eq, %arg1, %c0_i32 : i32
    %1 = arith.extui %0 : i1 to i32
    %c0_i32_0 = arith.constant 0 : i32
    %2 = arith.cmpi ne, %1, %c0_i32_0 : i32
    scf.if %2 {
      %c0_89 = arith.constant 0 : index
      %c0_90 = arith.constant 0 : index
      %c0_91 = arith.constant 0 : index
      %224 = vector.load %arg2[%c0_89, %c0_90, %c0_91] : memref<1x8x32xf32, #tpu.memory_space<vmem>>, vector<1x8x32xf32>
      %cst_92 = arith.constant 5.65685415 : f32
      %225 = vector.broadcast %cst_92 : f32 to vector<1x8x32xf32>
      %226 = arith.mulf %224, %225 : vector<1x8x32xf32>
      %c0_93 = arith.constant 0 : index
      %c0_94 = arith.constant 0 : index
      %227 = vector.load %arg3[%c0_93, %c0_94] : memref<8x32xf32, #tpu.memory_space<vmem>>, vector<8x32xf32>
      %228 = vector.shape_cast %227 : vector<8x32xf32> to vector<1x8x32xf32>
      %229 = arith.addf %226, %228 : vector<1x8x32xf32>
      %230 = vector.shape_cast %229 : vector<1x8x32xf32> to vector<8x32xf32>
      %c0_95 = arith.constant 0 : index
      %c0_96 = arith.constant 0 : index
      %231 = vector.load %arg18[%c0_95, %c0_96] : memref<8x32xf32, #tpu.memory_space<vmem>>, vector<8x32xf32>
      tpu.vector_store %arg18[%c0_95, %c0_96], %230 {strides = array<i32>} : memref<8x32xf32, #tpu.memory_space<vmem>>, vector<8x32xf32>,
    } else {
    }
    %c0 = arith.constant 0 : index
    %c0_1 = arith.constant 0 : index
    %3 = vector.load %arg18[%c0, %c0_1] : memref<8x32xf32, #tpu.memory_space<vmem>>, vector<8x32xf32>
    %c0_2 = arith.constant 0 : index
    %c0_3 = arith.constant 0 : index
    %c0_4 = arith.constant 0 : index
    %4 = vector.load %arg4[%c0_2, %c0_3, %c0_4] : memref<1x1x8xf32, #tpu.memory_space<vmem>>, vector<1x1x8xf32>
    %5 = tpu.iota {dimensions = array<i32: 0>} : vector<8x1xi32>
    %c8_i32 = arith.constant 8 : i32
    %c0_i32_5 = arith.constant 0 : i32
    %6 = arith.cmpi eq, %c8_i32, %c0_i32_5 : i32
    %c1_i32 = arith.constant 1 : i32
    %7 = arith.select %6, %c1_i32, %c8_i32 : i32
    %8 = vector.broadcast %7 : i32 to vector<8x1xi32>
    %9 = arith.remsi %5, %8 : vector<8x1xi32>
    %c0_i32_6 = arith.constant 0 : i32
    %10 = vector.broadcast %c0_i32_6 : i32 to vector<8x1xi32>
    %11 = arith.cmpi ne, %9, %10 : vector<8x1xi32>
    %c0_i32_7 = arith.constant 0 : i32
    %12 = vector.broadcast %c0_i32_7 : i32 to vector<8x1xi32>
    %13 = arith.cmpi slt, %9, %12 : vector<8x1xi32>
    %c0_i32_8 = arith.constant 0 : i32
    %14 = arith.cmpi slt, %7, %c0_i32_8 : i32
    %15 = vector.broadcast %14 : i1 to vector<8x1xi1>
    %16 = vector.broadcast %15 : vector<8x1xi1> to vector<8x1xi1>
    %17 = arith.xori %13, %16 : vector<8x1xi1>
    %18 = arith.andi %17, %11 : vector<8x1xi1>
    %19 = vector.broadcast %7 : i32 to vector<8x1xi32>
    %20 = arith.addi %9, %19 : vector<8x1xi32>
    %21 = arith.select %18, %20, %9 : vector<8x1xi1>, vector<8x1xi32>
    %c-1_i32 = arith.constant -1 : i32
    %22 = vector.broadcast %c-1_i32 : i32 to vector<8x1xi32>
    %23 = arith.addi %21, %22 : vector<8x1xi32>
    %c0_i32_9 = arith.constant 0 : i32
    %24 = vector.broadcast %c0_i32_9 : i32 to vector<8x1xi32>
    %25 = arith.cmpi sge, %23, %24 : vector<8x1xi32>
    %c-1_i32_10 = arith.constant -1 : i32
    %26 = vector.broadcast %c-1_i32_10 : i32 to vector<8x1xi32>
    %27 = arith.addi %21, %26 : vector<8x1xi32>
    %c8_i32_11 = arith.constant 8 : i32
    %28 = vector.broadcast %c8_i32_11 : i32 to vector<8x1xi32>
    %29 = arith.cmpi slt, %27, %28 : vector<8x1xi32>
    %30 = arith.andi %25, %29 : vector<8x1xi1>
    %31 = arith.extui %30 : vector<8x1xi1> to vector<8x1xi32>
    %32 = arith.sitofp %31 : vector<8x1xi32> to vector<8x1xf32>
    %c1_i32_12 = arith.constant 1 : i32
    %33 = vector.broadcast %c1_i32_12 : i32 to vector<8x1xi32>
    %34 = arith.addi %21, %33 : vector<8x1xi32>
    %c0_i32_13 = arith.constant 0 : i32
    %35 = vector.broadcast %c0_i32_13 : i32 to vector<8x1xi32>
    %36 = arith.cmpi sge, %34, %35 : vector<8x1xi32>
    %c1_i32_14 = arith.constant 1 : i32
    %37 = vector.broadcast %c1_i32_14 : i32 to vector<8x1xi32>
    %38 = arith.addi %21, %37 : vector<8x1xi32>
    %c8_i32_15 = arith.constant 8 : i32
    %39 = vector.broadcast %c8_i32_15 : i32 to vector<8x1xi32>
    %40 = arith.cmpi slt, %38, %39 : vector<8x1xi32>
    %41 = arith.andi %36, %40 : vector<8x1xi1>
    %42 = arith.extui %41 : vector<8x1xi1> to vector<8x1xi32>
    %43 = arith.sitofp %42 : vector<8x1xi32> to vector<8x1xf32>
    %44 = arith.truncf %3 : vector<8x32xf32> to vector<8x32xbf16>
    %c0_16 = arith.constant 0 : index
    %c0_17 = arith.constant 0 : index
    %c0_18 = arith.constant 0 : index
    %45 = vector.load %arg5[%c0_16, %c0_17, %c0_18] : memref<1x32x96xbf16, #tpu.memory_space<vmem>>, vector<1x32x96xbf16>
    %46 = vector.shape_cast %45 : vector<1x32x96xbf16> to vector<32x96xbf16>
    %cst = arith.constant dense<0.000000e+00> : vector<8x96xf32>
    %47 = tpu.matmul %44, %46, %cst {dimension_numbers = #tpu.dot_dimension_numbers<[1], [0], [0], [1], [0, 0, 1, 1], [], []>} : vector<8x32xbf16>, vector<32x96xbf16>, vector<8x96xf32> -> vector<8x96xf32>
    %c0_19 = arith.constant 0 : index
    %c0_20 = arith.constant 0 : index
    %c0_21 = arith.constant 0 : index
    %48 = vector.load %arg6[%c0_19, %c0_20, %c0_21] : memref<1x1x96xf32, #tpu.memory_space<vmem>>, vector<1x1x96xf32>
    %49 = vector.shape_cast %48 : vector<1x1x96xf32> to vector<1x96xf32>
    %50 = vector.broadcast %49 : vector<1x96xf32> to vector<8x96xf32>
    %51 = arith.addf %47, %50 : vector<8x96xf32>
    %52 = vector.extract_strided_slice %51 {offsets = [0, 0], sizes = [8, 32], strides = [1, 1]} : vector<8x96xf32> to vector<8x32xf32>
    %53 = vector.shape_cast %52 : vector<8x32xf32> to vector<1x8x32xf32>
    %54 = vector.extract_strided_slice %51 {offsets = [0, 32], sizes = [8, 32], strides = [1, 1]} : vector<8x96xf32> to vector<8x32xf32>
    %55 = vector.shape_cast %54 : vector<8x32xf32> to vector<1x8x32xf32>
    %56 = vector.extract_strided_slice %51 {offsets = [0, 64], sizes = [8, 32], strides = [1, 1]} : vector<8x96xf32> to vector<8x32xf32>
    %57 = vector.shape_cast %56 : vector<8x32xf32> to vector<1x8x32xf32>
    %58 = vector.extract_strided_slice %53 {offsets = [0, 0, 0], sizes = [1, 8, 16], strides = [1, 1, 1]} : vector<1x8x32xf32> to vector<1x8x16xf32>
    %59 = arith.truncf %58 : vector<1x8x16xf32> to vector<1x8x16xbf16>
    %60 = vector.extract_strided_slice %55 {offsets = [0, 0, 0], sizes = [1, 8, 16], strides = [1, 1, 1]} : vector<1x8x32xf32> to vector<1x8x16xf32>
    %61 = arith.truncf %60 : vector<1x8x16xf32> to vector<1x8x16xbf16>
    %62 = vector.extract_strided_slice %57 {offsets = [0, 0, 0], sizes = [1, 8, 16], strides = [1, 1, 1]} : vector<1x8x32xf32> to vector<1x8x16xf32>
    %63 = arith.truncf %62 : vector<1x8x16xf32> to vector<1x8x16xbf16>
    "tpu.trace_start"() <{level = 10 : i32, message = "bqd,bkd->bqk"}> : () -> ()
    %cst_22 = arith.constant dense<0.000000e+00> : vector<1x8x8xf32>
    %64 = tpu.matmul %59, %61, %cst_22 {dimension_numbers = #tpu.dot_dimension_numbers<[2], [2], [1], [1], [0, 0, 0, 1, 1, 1], [0], [0]>} : vector<1x8x16xbf16>, vector<1x8x16xbf16>, vector<1x8x8xf32> -> vector<1x8x8xf32>
    "tpu.trace_stop"() : () -> ()
    %cst_23 = arith.constant 2.500000e-01 : f32
    %65 = vector.broadcast %cst_23 : f32 to vector<1x8x8xf32>
    %66 = arith.mulf %64, %65 : vector<1x8x8xf32>
    %67 = vector.broadcast %4 : vector<1x1x8xf32> to vector<1x8x8xf32>
    %68 = arith.addf %66, %67 : vector<1x8x8xf32>
    %cst_24 = arith.constant dense<0xFF800000> : vector<1x8xf32>
    %69 = vector.multi_reduction <maximumf>, %68, %cst_24 [2] : vector<1x8x8xf32> to vector<1x8xf32>
    %70 = vector.shape_cast %69 : vector<1x8xf32> to vector<1x8x1xf32>
    %71 = vector.broadcast %70 : vector<1x8x1xf32> to vector<1x8x8xf32>
    %72 = arith.subf %68, %71 : vector<1x8x8xf32>
    %73 = math.exp %72 : vector<1x8x8xf32>
    %cst_25 = arith.constant dense<0.000000e+00> : vector<1x8xf32>
    %74 = vector.multi_reduction <add>, %73, %cst_25 [2] : vector<1x8x8xf32> to vector<1x8xf32>
    %75 = vector.shape_cast %74 : vector<1x8xf32> to vector<1x8x1xf32>
    %76 = vector.broadcast %75 : vector<1x8x1xf32> to vector<1x8x8xf32>
    %77 = arith.divf %73, %76 : vector<1x8x8xf32>
    %78 = arith.truncf %77 : vector<1x8x8xf32> to vector<1x8x8xbf16>
    "tpu.trace_start"() <{level = 10 : i32, message = "bqk,bkd->bqd"}> : () -> ()
    %cst_26 = arith.constant dense<0.000000e+00> : vector<1x8x16xf32>
    %79 = tpu.matmul %78, %63, %cst_26 {dimension_numbers = #tpu.dot_dimension_numbers<[2], [1], [1], [2], [0, 0, 0, 1, 1, 2], [0], [0]>} : vector<1x8x8xbf16>, vector<1x8x16xbf16>, vector<1x8x16xf32> -> vector<1x8x16xf32>
    "tpu.trace_stop"() : () -> ()
    %80 = vector.extract_strided_slice %53 {offsets = [0, 0, 16], sizes = [1, 8, 16], strides = [1, 1, 1]} : vector<1x8x32xf32> to vector<1x8x16xf32>
    %81 = arith.truncf %80 : vector<1x8x16xf32> to vector<1x8x16xbf16>
    %82 = vector.extract_strided_slice %55 {offsets = [0, 0, 16], sizes = [1, 8, 16], strides = [1, 1, 1]} : vector<1x8x32xf32> to vector<1x8x16xf32>
    %83 = arith.truncf %82 : vector<1x8x16xf32> to vector<1x8x16xbf16>
    %84 = vector.extract_strided_slice %57 {offsets = [0, 0, 16], sizes = [1, 8, 16], strides = [1, 1, 1]} : vector<1x8x32xf32> to vector<1x8x16xf32>
    %85 = arith.truncf %84 : vector<1x8x16xf32> to vector<1x8x16xbf16>
    "tpu.trace_start"() <{level = 10 : i32, message = "bqd,bkd->bqk"}> : () -> ()
    %cst_27 = arith.constant dense<0.000000e+00> : vector<1x8x8xf32>
    %86 = tpu.matmul %81, %83, %cst_27 {dimension_numbers = #tpu.dot_dimension_numbers<[2], [2], [1], [1], [0, 0, 0, 1, 1, 1], [0], [0]>} : vector<1x8x16xbf16>, vector<1x8x16xbf16>, vector<1x8x8xf32> -> vector<1x8x8xf32>
    "tpu.trace_stop"() : () -> ()
    %cst_28 = arith.constant 2.500000e-01 : f32
    %87 = vector.broadcast %cst_28 : f32 to vector<1x8x8xf32>
    %88 = arith.mulf %86, %87 : vector<1x8x8xf32>
    %89 = vector.broadcast %4 : vector<1x1x8xf32> to vector<1x8x8xf32>
    %90 = arith.addf %88, %89 : vector<1x8x8xf32>
    %cst_29 = arith.constant dense<0xFF800000> : vector<1x8xf32>
    %91 = vector.multi_reduction <maximumf>, %90, %cst_29 [2] : vector<1x8x8xf32> to vector<1x8xf32>
    %92 = vector.shape_cast %91 : vector<1x8xf32> to vector<1x8x1xf32>
    %93 = vector.broadcast %92 : vector<1x8x1xf32> to vector<1x8x8xf32>
    %94 = arith.subf %90, %93 : vector<1x8x8xf32>
    %95 = math.exp %94 : vector<1x8x8xf32>
    %cst_30 = arith.constant dense<0.000000e+00> : vector<1x8xf32>
    %96 = vector.multi_reduction <add>, %95, %cst_30 [2] : vector<1x8x8xf32> to vector<1x8xf32>
    %97 = vector.shape_cast %96 : vector<1x8xf32> to vector<1x8x1xf32>
    %98 = vector.broadcast %97 : vector<1x8x1xf32> to vector<1x8x8xf32>
    %99 = arith.divf %95, %98 : vector<1x8x8xf32>
    %100 = arith.truncf %99 : vector<1x8x8xf32> to vector<1x8x8xbf16>
    "tpu.trace_start"() <{level = 10 : i32, message = "bqk,bkd->bqd"}> : () -> ()
    %cst_31 = arith.constant dense<0.000000e+00> : vector<1x8x16xf32>
    %101 = tpu.matmul %100, %85, %cst_31 {dimension_numbers = #tpu.dot_dimension_numbers<[2], [1], [1], [2], [0, 0, 0, 1, 1, 2], [0], [0]>} : vector<1x8x8xbf16>, vector<1x8x16xbf16>, vector<1x8x16xf32> -> vector<1x8x16xf32>
    "tpu.trace_stop"() : () -> ()
    %102 = tpu.concatenate %79, %101 in 2 : vector<1x8x16xf32>, vector<1x8x16xf32> -> vector<1x8x32xf32>
    %103 = vector.shape_cast %102 : vector<1x8x32xf32> to vector<8x32xf32>
    %104 = arith.truncf %103 : vector<8x32xf32> to vector<8x32xbf16>
    %c0_32 = arith.constant 0 : index
    %c0_33 = arith.constant 0 : index
    %c0_34 = arith.constant 0 : index
    %105 = vector.load %arg7[%c0_32, %c0_33, %c0_34] : memref<1x32x32xbf16, #tpu.memory_space<vmem>>, vector<1x32x32xbf16>
    %106 = vector.shape_cast %105 : vector<1x32x32xbf16> to vector<32x32xbf16>
    %cst_35 = arith.constant dense<0.000000e+00> : vector<8x32xf32>
    %107 = tpu.matmul %104, %106, %cst_35 {dimension_numbers = #tpu.dot_dimension_numbers<[1], [0], [0], [1], [0, 0, 1, 1], [], []>} : vector<8x32xbf16>, vector<32x32xbf16>, vector<8x32xf32> -> vector<8x32xf32>
    %c0_36 = arith.constant 0 : index
    %c0_37 = arith.constant 0 : index
    %c0_38 = arith.constant 0 : index
    %108 = vector.load %arg8[%c0_36, %c0_37, %c0_38] : memref<1x1x32xf32, #tpu.memory_space<vmem>>, vector<1x1x32xf32>
    %109 = vector.shape_cast %108 : vector<1x1x32xf32> to vector<1x32xf32>
    %110 = vector.broadcast %109 : vector<1x32xf32> to vector<8x32xf32>
    %111 = arith.addf %107, %110 : vector<8x32xf32>
    %112 = arith.addf %3, %111 : vector<8x32xf32>
    %c0_39 = arith.constant 0 : index
    %c0_40 = arith.constant 0 : index
    %c0_41 = arith.constant 0 : index
    %113 = vector.load %arg9[%c0_39, %c0_40, %c0_41] : memref<1x1x32xf32, #tpu.memory_space<vmem>>, vector<1x1x32xf32>
    %114 = vector.shape_cast %113 : vector<1x1x32xf32> to vector<1x32xf32>
    %c0_42 = arith.constant 0 : index
    %c0_43 = arith.constant 0 : index
    %c0_44 = arith.constant 0 : index
    %115 = vector.load %arg10[%c0_42, %c0_43, %c0_44] : memref<1x1x32xf32, #tpu.memory_space<vmem>>, vector<1x1x32xf32>
    %116 = vector.shape_cast %115 : vector<1x1x32xf32> to vector<1x32xf32>
    %cst_45 = arith.constant dense<0.000000e+00> : vector<8xf32>
    %117 = vector.multi_reduction <add>, %112, %cst_45 [1] : vector<8x32xf32> to vector<8xf32>
    %118 = vector.shape_cast %117 : vector<8xf32> to vector<8x1xf32>
    %cst_46 = arith.constant 3.200000e+01 : f32
    %119 = vector.broadcast %cst_46 : f32 to vector<8x1xf32>
    %120 = arith.divf %118, %119 : vector<8x1xf32>
    %121 = vector.broadcast %120 : vector<8x1xf32> to vector<8x32xf32>
    %122 = arith.subf %112, %121 : vector<8x32xf32>
    %123 = arith.mulf %122, %122 : vector<8x32xf32>
    %cst_47 = arith.constant dense<0.000000e+00> : vector<8xf32>
    %124 = vector.multi_reduction <add>, %123, %cst_47 [1] : vector<8x32xf32> to vector<8xf32>
    %125 = vector.shape_cast %124 : vector<8xf32> to vector<8x1xf32>
    %cst_48 = arith.constant 3.200000e+01 : f32
    %126 = vector.broadcast %cst_48 : f32 to vector<8x1xf32>
    %127 = arith.divf %125, %126 : vector<8x1xf32>
    %128 = vector.broadcast %120 : vector<8x1xf32> to vector<8x32xf32>
    %129 = arith.subf %112, %128 : vector<8x32xf32>
    %cst_49 = arith.constant 9.99999974E-6 : f32
    %130 = vector.broadcast %cst_49 : f32 to vector<8x1xf32>
    %131 = arith.addf %127, %130 : vector<8x1xf32>
    %132 = math.rsqrt %131 : vector<8x1xf32>
    %133 = vector.broadcast %132 : vector<8x1xf32> to vector<8x32xf32>
    %134 = arith.mulf %129, %133 : vector<8x32xf32>
    %135 = vector.broadcast %114 : vector<1x32xf32> to vector<8x32xf32>
    %136 = arith.mulf %134, %135 : vector<8x32xf32>
    %137 = vector.broadcast %116 : vector<1x32xf32> to vector<8x32xf32>
    %138 = arith.addf %136, %137 : vector<8x32xf32>
    %c0_50 = arith.constant 0 : index
    %c0_51 = arith.constant 0 : index
    %c0_52 = arith.constant 0 : index
    %c0_53 = arith.constant 0 : index
    %139 = vector.load %arg11[%c0_50, %c0_51, %c0_52, %c0_53] : memref<1x3x32x64xbf16, #tpu.memory_space<vmem>>, vector<1x3x32x64xbf16>
    %140 = vector.shape_cast %139 : vector<1x3x32x64xbf16> to vector<3x32x64xbf16>
    %c0_54 = arith.constant 0 : index
    %c0_55 = arith.constant 0 : index
    %c0_56 = arith.constant 0 : index
    %141 = vector.load %arg12[%c0_54, %c0_55, %c0_56] : memref<1x1x64xf32, #tpu.memory_space<vmem>>, vector<1x1x64xf32>
    %142 = vector.shape_cast %141 : vector<1x1x64xf32> to vector<1x64xf32>
    %143 = arith.truncf %138 : vector<8x32xf32> to vector<8x32xbf16>
    %144 = vector.extract_strided_slice %140 {offsets = [1, 0, 0], sizes = [1, 32, 64], strides = [1, 1, 1]} : vector<3x32x64xbf16> to vector<1x32x64xbf16>
    %145 = vector.shape_cast %144 : vector<1x32x64xbf16> to vector<32x64xbf16>
    %cst_57 = arith.constant dense<0.000000e+00> : vector<8x64xf32>
    %146 = tpu.matmul %143, %145, %cst_57 {dimension_numbers = #tpu.dot_dimension_numbers<[1], [0], [0], [1], [0, 0, 1, 1], [], []>} : vector<8x32xbf16>, vector<32x64xbf16>, vector<8x64xf32> -> vector<8x64xf32>
    %c1_i32_58 = arith.constant 1 : i32
    %147 = tpu.dynamic_rotate %138 by %c1_i32_58 dim 0 : vector<8x32xf32>, i32 -> vector<8x32xf32>
    %148 = vector.broadcast %32 : vector<8x1xf32> to vector<8x32xf32>
    %149 = arith.mulf %147, %148 : vector<8x32xf32>
    %150 = arith.truncf %149 : vector<8x32xf32> to vector<8x32xbf16>
    %151 = vector.extract_strided_slice %140 {offsets = [0, 0, 0], sizes = [1, 32, 64], strides = [1, 1, 1]} : vector<3x32x64xbf16> to vector<1x32x64xbf16>
    %152 = vector.shape_cast %151 : vector<1x32x64xbf16> to vector<32x64xbf16>
    %cst_59 = arith.constant dense<0.000000e+00> : vector<8x64xf32>
    %153 = tpu.matmul %150, %152, %cst_59 {dimension_numbers = #tpu.dot_dimension_numbers<[1], [0], [0], [1], [0, 0, 1, 1], [], []>} : vector<8x32xbf16>, vector<32x64xbf16>, vector<8x64xf32> -> vector<8x64xf32>
    %154 = arith.addf %146, %153 : vector<8x64xf32>
    %c7_i32 = arith.constant 7 : i32
    %155 = tpu.dynamic_rotate %138 by %c7_i32 dim 0 : vector<8x32xf32>, i32 -> vector<8x32xf32>
    %156 = vector.broadcast %43 : vector<8x1xf32> to vector<8x32xf32>
    %157 = arith.mulf %155, %156 : vector<8x32xf32>
    %158 = arith.truncf %157 : vector<8x32xf32> to vector<8x32xbf16>
    %159 = vector.extract_strided_slice %140 {offsets = [2, 0, 0], sizes = [1, 32, 64], strides = [1, 1, 1]} : vector<3x32x64xbf16> to vector<1x32x64xbf16>
    %160 = vector.shape_cast %159 : vector<1x32x64xbf16> to vector<32x64xbf16>
    %cst_60 = arith.constant dense<0.000000e+00> : vector<8x64xf32>
    %161 = tpu.matmul %158, %160, %cst_60 {dimension_numbers = #tpu.dot_dimension_numbers<[1], [0], [0], [1], [0, 0, 1, 1], [], []>} : vector<8x32xbf16>, vector<32x64xbf16>, vector<8x64xf32> -> vector<8x64xf32>
    %162 = arith.addf %154, %161 : vector<8x64xf32>
    %163 = vector.broadcast %142 : vector<1x64xf32> to vector<8x64xf32>
    %164 = arith.addf %162, %163 : vector<8x64xf32>
    %cst_61 = arith.constant 0.000000e+00 : f32
    %165 = vector.broadcast %cst_61 : f32 to vector<8x64xf32>
    %166 = arith.maximumf %164, %165 : vector<8x64xf32>
    %c0_62 = arith.constant 0 : index
    %c0_63 = arith.constant 0 : index
    %c0_64 = arith.constant 0 : index
    %c0_65 = arith.constant 0 : index
    %167 = vector.load %arg13[%c0_62, %c0_63, %c0_64, %c0_65] : memref<1x3x64x32xbf16, #tpu.memory_space<vmem>>, vector<1x3x64x32xbf16>
    %168 = vector.shape_cast %167 : vector<1x3x64x32xbf16> to vector<3x64x32xbf16>
    %c0_66 = arith.constant 0 : index
    %c0_67 = arith.constant 0 : index
    %c0_68 = arith.constant 0 : index
    %169 = vector.load %arg14[%c0_66, %c0_67, %c0_68] : memref<1x1x32xf32, #tpu.memory_space<vmem>>, vector<1x1x32xf32>
    %170 = vector.shape_cast %169 : vector<1x1x32xf32> to vector<1x32xf32>
    %171 = arith.truncf %166 : vector<8x64xf32> to vector<8x64xbf16>
    %172 = vector.extract_strided_slice %168 {offsets = [1, 0, 0], sizes = [1, 64, 32], strides = [1, 1, 1]} : vector<3x64x32xbf16> to vector<1x64x32xbf16>
    %173 = vector.shape_cast %172 : vector<1x64x32xbf16> to vector<64x32xbf16>
    %cst_69 = arith.constant dense<0.000000e+00> : vector<8x32xf32>
    %174 = tpu.matmul %171, %173, %cst_69 {dimension_numbers = #tpu.dot_dimension_numbers<[1], [0], [0], [1], [0, 0, 1, 1], [], []>} : vector<8x64xbf16>, vector<64x32xbf16>, vector<8x32xf32> -> vector<8x32xf32>
    %c1_i32_70 = arith.constant 1 : i32
    %175 = tpu.dynamic_rotate %166 by %c1_i32_70 dim 0 : vector<8x64xf32>, i32 -> vector<8x64xf32>
    %176 = vector.broadcast %32 : vector<8x1xf32> to vector<8x64xf32>
    %177 = arith.mulf %175, %176 : vector<8x64xf32>
    %178 = arith.truncf %177 : vector<8x64xf32> to vector<8x64xbf16>
    %179 = vector.extract_strided_slice %168 {offsets = [0, 0, 0], sizes = [1, 64, 32], strides = [1, 1, 1]} : vector<3x64x32xbf16> to vector<1x64x32xbf16>
    %180 = vector.shape_cast %179 : vector<1x64x32xbf16> to vector<64x32xbf16>
    %cst_71 = arith.constant dense<0.000000e+00> : vector<8x32xf32>
    %181 = tpu.matmul %178, %180, %cst_71 {dimension_numbers = #tpu.dot_dimension_numbers<[1], [0], [0], [1], [0, 0, 1, 1], [], []>} : vector<8x64xbf16>, vector<64x32xbf16>, vector<8x32xf32> -> vector<8x32xf32>
    %182 = arith.addf %174, %181 : vector<8x32xf32>
    %c7_i32_72 = arith.constant 7 : i32
    %183 = tpu.dynamic_rotate %166 by %c7_i32_72 dim 0 : vector<8x64xf32>, i32 -> vector<8x64xf32>
    %184 = vector.broadcast %43 : vector<8x1xf32> to vector<8x64xf32>
    %185 = arith.mulf %183, %184 : vector<8x64xf32>
    %186 = arith.truncf %185 : vector<8x64xf32> to vector<8x64xbf16>
    %187 = vector.extract_strided_slice %168 {offsets = [2, 0, 0], sizes = [1, 64, 32], strides = [1, 1, 1]} : vector<3x64x32xbf16> to vector<1x64x32xbf16>
    %188 = vector.shape_cast %187 : vector<1x64x32xbf16> to vector<64x32xbf16>
    %cst_73 = arith.constant dense<0.000000e+00> : vector<8x32xf32>
    %189 = tpu.matmul %186, %188, %cst_73 {dimension_numbers = #tpu.dot_dimension_numbers<[1], [0], [0], [1], [0, 0, 1, 1], [], []>} : vector<8x64xbf16>, vector<64x32xbf16>, vector<8x32xf32> -> vector<8x32xf32>
    %190 = arith.addf %182, %189 : vector<8x32xf32>
    %191 = vector.broadcast %170 : vector<1x32xf32> to vector<8x32xf32>
    %192 = arith.addf %190, %191 : vector<8x32xf32>
    %193 = arith.addf %138, %192 : vector<8x32xf32>
    %c0_74 = arith.constant 0 : index
    %c0_75 = arith.constant 0 : index
    %c0_76 = arith.constant 0 : index
    %194 = vector.load %arg15[%c0_74, %c0_75, %c0_76] : memref<1x1x32xf32, #tpu.memory_space<vmem>>, vector<1x1x32xf32>
    %195 = vector.shape_cast %194 : vector<1x1x32xf32> to vector<1x32xf32>
    %c0_77 = arith.constant 0 : index
    %c0_78 = arith.constant 0 : index
    %c0_79 = arith.constant 0 : index
    %196 = vector.load %arg16[%c0_77, %c0_78, %c0_79] : memref<1x1x32xf32, #tpu.memory_space<vmem>>, vector<1x1x32xf32>
    %197 = vector.shape_cast %196 : vector<1x1x32xf32> to vector<1x32xf32>
    %cst_80 = arith.constant dense<0.000000e+00> : vector<8xf32>
    %198 = vector.multi_reduction <add>, %193, %cst_80 [1] : vector<8x32xf32> to vector<8xf32>
    %199 = vector.shape_cast %198 : vector<8xf32> to vector<8x1xf32>
    %cst_81 = arith.constant 3.200000e+01 : f32
    %200 = vector.broadcast %cst_81 : f32 to vector<8x1xf32>
    %201 = arith.divf %199, %200 : vector<8x1xf32>
    %202 = vector.broadcast %201 : vector<8x1xf32> to vector<8x32xf32>
    %203 = arith.subf %193, %202 : vector<8x32xf32>
    %204 = arith.mulf %203, %203 : vector<8x32xf32>
    %cst_82 = arith.constant dense<0.000000e+00> : vector<8xf32>
    %205 = vector.multi_reduction <add>, %204, %cst_82 [1] : vector<8x32xf32> to vector<8xf32>
    %206 = vector.shape_cast %205 : vector<8xf32> to vector<8x1xf32>
    %cst_83 = arith.constant 3.200000e+01 : f32
    %207 = vector.broadcast %cst_83 : f32 to vector<8x1xf32>
    %208 = arith.divf %206, %207 : vector<8x1xf32>
    %209 = vector.broadcast %201 : vector<8x1xf32> to vector<8x32xf32>
    %210 = arith.subf %193, %209 : vector<8x32xf32>
    %cst_84 = arith.constant 9.99999974E-6 : f32
    %211 = vector.broadcast %cst_84 : f32 to vector<8x1xf32>
    %212 = arith.addf %208, %211 : vector<8x1xf32>
    %213 = math.rsqrt %212 : vector<8x1xf32>
    %214 = vector.broadcast %213 : vector<8x1xf32> to vector<8x32xf32>
    %215 = arith.mulf %210, %214 : vector<8x32xf32>
    %216 = vector.broadcast %195 : vector<1x32xf32> to vector<8x32xf32>
    %217 = arith.mulf %215, %216 : vector<8x32xf32>
    %218 = vector.broadcast %197 : vector<1x32xf32> to vector<8x32xf32>
    %219 = arith.addf %217, %218 : vector<8x32xf32>
    %c0_85 = arith.constant 0 : index
    %c0_86 = arith.constant 0 : index
    %220 = vector.load %arg18[%c0_85, %c0_86] : memref<8x32xf32, #tpu.memory_space<vmem>>, vector<8x32xf32>
    tpu.vector_store %arg18[%c0_85, %c0_86], %219 {strides = array<i32>} : memref<8x32xf32, #tpu.memory_space<vmem>>, vector<8x32xf32>,
    %c1_i32_87 = arith.constant 1 : i32
    %221 = arith.cmpi eq, %arg1, %c1_i32_87 : i32
    %222 = arith.extui %221 : i1 to i32
    %c0_i32_88 = arith.constant 0 : i32
    %223 = arith.cmpi ne, %222, %c0_i32_88 : i32
    scf.if %223 {
      %224 = vector.shape_cast %219 : vector<8x32xf32> to vector<1x8x32xf32>
      %c0_89 = arith.constant 0 : index
      %c0_90 = arith.constant 0 : index
      %c0_91 = arith.constant 0 : index
      %225 = vector.load %arg17[%c0_89, %c0_90, %c0_91] : memref<1x8x32xf32, #tpu.memory_space<vmem>>, vector<1x8x32xf32>
      tpu.vector_store %arg17[%c0_89, %c0_90, %c0_91], %224 {strides = array<i32>} : memref<1x8x32xf32, #tpu.memory_space<vmem>>, vector<1x8x32xf32>,
    } else {
    }
    return
  }
  func.func @transform_0(%arg0: i32, %arg1: i32) -> (i32, i32, i32) {
    %c0_i32 = arith.constant 0 : i32
    %c0_i32_0 = arith.constant 0 : i32
    %c0_i32_1 = arith.constant 0 : i32
    return %arg0, %c0_i32, %c0_i32_0 : i32, i32, i32
  }
  func.func @transform_1(%arg0: i32, %arg1: i32) -> (i32, i32) {
    %c0_i32 = arith.constant 0 : i32
    %c0_i32_0 = arith.constant 0 : i32
    %c0_i32_1 = arith.constant 0 : i32
    return %c0_i32, %c0_i32_0 : i32, i32
  }
  func.func @transform_2(%arg0: i32, %arg1: i32) -> (i32, i32, i32) {
    %c0_i32 = arith.constant 0 : i32
    %c0_i32_0 = arith.constant 0 : i32
    %c0_i32_1 = arith.constant 0 : i32
    return %arg0, %c0_i32, %c0_i32_0 : i32, i32, i32
  }
  func.func @transform_3(%arg0: i32, %arg1: i32) -> (i32, i32, i32) {
    %c0_i32 = arith.constant 0 : i32
    %c0_i32_0 = arith.constant 0 : i32
    %c0_i32_1 = arith.constant 0 : i32
    return %arg1, %c0_i32, %c0_i32_0 : i32, i32, i32
  }
  func.func @transform_4(%arg0: i32, %arg1: i32) -> (i32, i32, i32) {
    %c0_i32 = arith.constant 0 : i32
    %c0_i32_0 = arith.constant 0 : i32
    %c0_i32_1 = arith.constant 0 : i32
    return %arg1, %c0_i32, %c0_i32_0 : i32, i32, i32
  }
  func.func @transform_5(%arg0: i32, %arg1: i32) -> (i32, i32, i32) {
    %c0_i32 = arith.constant 0 : i32
    %c0_i32_0 = arith.constant 0 : i32
    %c0_i32_1 = arith.constant 0 : i32
    return %arg1, %c0_i32, %c0_i32_0 : i32, i32, i32
  }
  func.func @transform_6(%arg0: i32, %arg1: i32) -> (i32, i32, i32) {
    %c0_i32 = arith.constant 0 : i32
    %c0_i32_0 = arith.constant 0 : i32
    %c0_i32_1 = arith.constant 0 : i32
    return %arg1, %c0_i32, %c0_i32_0 : i32, i32, i32
  }
  func.func @transform_7(%arg0: i32, %arg1: i32) -> (i32, i32, i32) {
    %c0_i32 = arith.constant 0 : i32
    %c0_i32_0 = arith.constant 0 : i32
    %c0_i32_1 = arith.constant 0 : i32
    return %arg1, %c0_i32, %c0_i32_0 : i32, i32, i32
  }
  func.func @transform_8(%arg0: i32, %arg1: i32) -> (i32, i32, i32) {
    %c0_i32 = arith.constant 0 : i32
    %c0_i32_0 = arith.constant 0 : i32
    %c0_i32_1 = arith.constant 0 : i32
    return %arg1, %c0_i32, %c0_i32_0 : i32, i32, i32
  }
  func.func @transform_9(%arg0: i32, %arg1: i32) -> (i32, i32, i32, i32) {
    %c0_i32 = arith.constant 0 : i32
    %c0_i32_0 = arith.constant 0 : i32
    %c0_i32_1 = arith.constant 0 : i32
    %c0_i32_2 = arith.constant 0 : i32
    return %arg1, %c0_i32, %c0_i32_0, %c0_i32_1 : i32, i32, i32, i32
  }
  func.func @transform_10(%arg0: i32, %arg1: i32) -> (i32, i32, i32) {
    %c0_i32 = arith.constant 0 : i32
    %c0_i32_0 = arith.constant 0 : i32
    %c0_i32_1 = arith.constant 0 : i32
    return %arg1, %c0_i32, %c0_i32_0 : i32, i32, i32
  }
  func.func @transform_11(%arg0: i32, %arg1: i32) -> (i32, i32, i32, i32) {
    %c0_i32 = arith.constant 0 : i32
    %c0_i32_0 = arith.constant 0 : i32
    %c0_i32_1 = arith.constant 0 : i32
    %c0_i32_2 = arith.constant 0 : i32
    return %arg1, %c0_i32, %c0_i32_0, %c0_i32_1 : i32, i32, i32, i32
  }
  func.func @transform_12(%arg0: i32, %arg1: i32) -> (i32, i32, i32) {
    %c0_i32 = arith.constant 0 : i32
    %c0_i32_0 = arith.constant 0 : i32
    %c0_i32_1 = arith.constant 0 : i32
    return %arg1, %c0_i32, %c0_i32_0 : i32, i32, i32
  }
  func.func @transform_13(%arg0: i32, %arg1: i32) -> (i32, i32, i32) {
    %c0_i32 = arith.constant 0 : i32
    %c0_i32_0 = arith.constant 0 : i32
    %c0_i32_1 = arith.constant 0 : i32
    return %arg1, %c0_i32, %c0_i32_0 : i32, i32, i32
  }
  func.func @transform_14(%arg0: i32, %arg1: i32) -> (i32, i32, i32) {
    %c0_i32 = arith.constant 0 : i32
    %c0_i32_0 = arith.constant 0 : i32
    %c0_i32_1 = arith.constant 0 : i32
    return %arg1, %c0_i32, %c0_i32_0 : i32, i32, i32
  }
  func.func @transform_15(%arg0: i32, %arg1: i32) -> (i32, i32, i32) {
    %c0_i32 = arith.constant 0 : i32
    %c0_i32_0 = arith.constant 0 : i32
    %c0_i32_1 = arith.constant 0 : i32
    return %arg0, %c0_i32, %c0_i32_0 : i32, i32, i32
  }
}

</mosaic_0001>

<bundles_post_ra>
// kernel: tpu_custom_call.1
= control target key start
LH: loop header
LB: loop body
LE: loop exit
PB: predicated region body
PF: predicated region fallthrough
CT: control target
= control target key end

     0   :  { %s4090_s0 = inlined_call_operand.hbm [shape: f32[2,8,32], index: 0, kind: input, shape index: {}]   ;;  %s4091_s1 = inlined_call_operand.hbm [shape: f32[8,32], index: 1, kind: input, shape index: {}]   ;;  %s4092_s2 = inlined_call_operand.hbm [shape: f32[2,1,8], index: 2, kind: input, shape index: {}]   ;;  %s4093_s3 = inlined_call_operand.hbm [shape: bf16[2,32,96], index: 3, kind: input, shape index: {}]   ;;  %s4094_s4 = inlined_call_operand.hbm [shape: f32[2,1,96], index: 4, kind: input, shape index: {}]   ;;  %s4095_s5 = inlined_call_operand.hbm [shape: bf16[2,32,32], index: 5, kind: input, shape index: {}]   ;;  %s4096_s6 = inlined_call_operand.hbm [shape: f32[2,1,32], index: 6, kind: input, shape index: {}]   ;;  %s4097_s7 = inlined_call_operand.hbm [shape: f32[2,1,32], index: 7, kind: input, shape index: {}]   ;;  %s4098_s8 = inlined_call_operand.hbm [shape: f32[2,1,32], index: 8, kind: input, shape index: {}]   ;;  %s4099_s9 = inlined_call_operand.hbm [shape: bf16[2,3,32,64], index: 9, kind: input, shape index: {}]   ;;  %s4100_s10 = inlined_call_operand.hbm [shape: f32[2,1,64], index: 10, kind: input, shape index: {}]   ;;  %s4101_s11 = inlined_call_operand.hbm [shape: bf16[2,3,64,32], index: 11, kind: input, shape index: {}]   ;;  %s4102_s12 = inlined_call_operand.hbm [shape: f32[2,1,32], index: 12, kind: input, shape index: {}]   ;;  %s4103_s13 = inlined_call_operand.hbm [shape: f32[2,1,32], index: 13, kind: input, shape index: {}]   ;;  %s4104_s14 = inlined_call_operand.hbm [shape: f32[2,1,32], index: 14, kind: input, shape index: {}]   ;;  %s4105_s15 = inlined_call_operand.hbm [shape: f32[2,8,32], index: 15, kind: output, shape index: {}]  }
   0x1   :  { %4144 = sst [smem:[#allocation40_spill]] %s4090_s0 }
   0x2   :  { %4145 = sst [smem:[#allocation41_spill]] %s4091_s1 }
   0x3   :  { %4146 = sst [smem:[#allocation42_spill]] %s4092_s2 }
   0x4   :  { %4147 = sst [smem:[#allocation43_spill]] %s4093_s3 }
   0x5   :  { %4148 = sst [smem:[#allocation44_spill]] %s4094_s4 }
   0x6   :  { %4149 = sst [smem:[#allocation45_spill]] %s4095_s5 }
   0x7   :  { %4150 = sst [smem:[#allocation46_spill]] %s4096_s6 }
   0x8   :  { %4151 = sst [smem:[#allocation47_spill]] %s4097_s7 }
   0x9   :  { %4152 = sst [smem:[#allocation48_spill]] %s4098_s8 }
   0xa   :  { %4153 = sst [smem:[#allocation49_spill]] %s4099_s9 }
   0xb   :  { %4154 = sst [smem:[#allocation50_spill]] %s4100_s10 }
   0xc   :  { %4155 = sst [smem:[#allocation51_spill]] %s4101_s11 }
   0xd   :  { %4156 = sst [smem:[#allocation52_spill]] %s4102_s12 }
   0xe   :  { %4157 = sst [smem:[#allocation53_spill]] %s4103_s13 }
   0xf   :  { %4158 = sst [smem:[#allocation54_spill]] %s4104_s14 }
  0x10   :  { %4159 = sst [smem:[#allocation55_spill]] %s4105_s15 }
  0x11   :  { %20 = vsyncpa [#allocation4], 0 }
  0x12   :  { %22 = vsyncpa [#allocation4 + $0x1], 0 }
  0x13   :  { %23 = vsyncpa [#allocation7], 0 }
  0x14   :  { %24 = vsyncpa [#allocation5], 0 }
  0x15   :  { %26 = vsyncpa [#allocation5 + $0x1], 0  ;;  %s3282_s18 = smov 0   ;;  %s3284_s19 = smov 0  }
  0x16   :  { %s3286_s20 = smov 0   ;;  %s3288_s21 = smov 0  }
  0x17   :  { %s3290_s22 = smov 0   ;;  %s3292_s23 = smov 0  }
  0x18   :  { %s3294_s24 = smov 0   ;;  %s3296_s25 = smov 0  }
  0x19   :  { %s3298_s26 = smov 0   ;;  %s3300_s27 = smov 0  }
  0x1a   :  { %s3302_s28 = smov 0  }
  0x1b LB: > { %4160 = sst [smem:[#allocation27_spill]] %s3138_s19  ;;  %s3338_s29 = sadd.s32 4294967295, %s3174_s28   ;;  %s3174_s28 = sphi %s3302_s28, %s32_s28   ;;  %s3170_s27 = sphi %s3300_s27, %s4238_s27   ;;  %s3166_s26 = sphi %s3298_s26, %s4237_s26   ;;  %s3162_s25 = sphi %s3296_s25, %s4236_s25   ;;  %s3158_s24 = sphi %s3294_s24, %s4235_s24   ;;  %s3154_s23 = sphi %s3292_s23, %s4234_s23   ;;  %s3150_s22 = sphi %s3290_s22, %s4233_s22   ;;  %s3146_s21 = sphi %s3288_s21, %s4232_s21   ;;  %s3142_s20 = sphi %s3286_s20, %s4231_s20   ;;  %s3138_s19 = sphi %s3284_s19, %s4230_s19   ;;  %s3134_s18 = sphi %s3282_s18, %s4225_s18  }
  0x1c   : > { %4161 = sst [smem:[#allocation28_spill]] %s3146_s21  ;;  %s2216_s30 = sadd.s32 4294967294, %s3174_s28  }
  0x1d   : > { %4162 = sst [smem:[#allocation29_spill]] %s3158_s24  ;;  %s41_s16 = sadd.s32 1, %s3166_s26 }
  0x1e   : > { %4163 = sst [smem:[#allocation30_spill]] %s3162_s25  ;;  %s44_s17 = sadd.s32 1, %s3170_s27 }
  0x1f   : > { %4164 = sst [smem:[#allocation31_spill]] %s3174_s28  ;;  %p42_p0 = scmp.ge.s32.totalorder %s41_s16, 2 }
  0x20   : > { %s51_s15 = sadd.s32 1, %s3154_s23  ;;  %p4115_p1 = scmp.ne.s32.totalorder %s3154_s23, %s3150_s22 }
  0x21   : > { %p59_p2 = scmp.eq.s32.totalorder %s3174_s28, 0  ;;  %s4240_s16 = smov (%p42_p0, %s41_s16), 0 }
  0x22   : > { %4165 = sst [smem:[#allocation32_spill]] %s4240_s16  ;;  %s4242_s17 = smov (!%p42_p0, %s44_s17), %s3170_s27 }
  0x23   : > { %p3355_p3 = por %p59_p2, %p4115_p1  ;;  %p4114_p4 = scmp.ne.s32.totalorder %s3150_s22, %s3146_s21 }
  0x24   : > { %p46_p5 = scmp.ge.s32.totalorder %s4242_s17, 2  ;;  %p4125_p6 = scmp.eq.s32.totalorder %s3338_s29, 0 }
  0x25   : > { %s4166_s25 = scalar_select %p3355_p3, 1, 0 }
  0x26   : > { %s121_s24 = ssub.s32 %s3166_s26, %s4240_s16  ;;  %s124_s14 = sadd.s32 1, %s3142_s20 }
  0x27   : > { %s4244_s17 = smov (%p46_p5, %s4242_s17), 0  ;;  %p3372_p7 = por %p4125_p6, %p4114_p4 }
  0x28   : > { %4167 = sst [smem:[#allocation33_spill]] %s4244_s17  ;;  %p122_p8 = scmp.eq.s32.totalorder %s121_s24, 0 }
  0x29   : > { %s4168_s13 = scalar_select %p3372_p7, 1, 0 }
  0x2a   : > { %s48_s12 = ssub.s32 %s3170_s27, %s4244_s17  ;;  %p131_p9 = scmp.ne.s32.totalorder %s3142_s20, %s3138_s19 }
  0x2b   : > { %4169 = sst [smem:[#allocation34_spill]] %s4168_s13  ;;  %p49_p10 = scmp.eq.s32.totalorder %s48_s12, 0 }
  0x2c   : > { %p137_p11 = scmp.ne.s32.totalorder %s3138_s19, %s3134_s18  ;;  %p3390_p12 = por %p131_p9, %p59_p2 }
  0x2d   : > { %s3383_s16 = scalar_select %p122_p8, %s3142_s20, %s124_s14  }
  0x2e   : > { %s3386_s11 = scalar_select %p49_p10, %s3154_s23, %s51_s15  }
  0x2f   : > { %4170 = sst [smem:[#allocation35_spill]] %s3383_s16  ;;  %p3396_p13 = por %p137_p11, %p4125_p6 }
  0x30   : > { %4171 = sst [smem:[#allocation36_spill]] %s3386_s11  ;;  %p447_p0 = scmp.eq.s32.totalorder %s3338_s29, 3 }
  0x31   : > { %s4172_s10 = scalar_select %p3390_p12, 1, 0 }
  0x32   : > { %s4173_s9 = scalar_select %p3396_p13, 1, 0 }
  0x33   : > { %p453_p5 = scmp.eq.s32.totalorder %s2216_s30, 3  ;;  %p2217_p4 = scmp.ge.s32.totalorder %s3174_s28, 1 }
  0x34   : > { %4174 = sst [smem:[#allocation37_spill]] %s4173_s9  ;;  %p460_p1 = scmp.lt.s32.totalorder %s3174_s28, 5 }
  0x35   : > { %p4175_p7 = scmp.ne.s32.totalorder %s3154_s23, %s3150_s22  ;;  %p4178_p8 = scmp.ne.s32.totalorder %s3150_s22, %s3146_s21 }
  0x36   : > { %p3417_p2 = pnand %p2217_p4, %p460_p1  ;;  %s3176_s18 = smov [#allocation6]  }
  0x37   : > { %p3406_p3 = por %p447_p0, %p4175_p7  ;;  %p3413_p10 = por %p453_p5, %p4178_p8 }
  0x38   : > { %s4181_s15 = scalar_select %p3417_p2, 1, 0 }
  0x39   : > { %s4176_s12 = scalar_select %p3406_p3, 1, 0 }
  0x3a   : > { %s4179_s14 = scalar_select %p3413_p10, 1, 0 }
  0x3b   : > { %4177 = sst [smem:[#allocation38_spill]] %s4176_s12  ;;  %p2476_p9 = pneg %p3417_p2 }
  0x3c   : > { %4180 = sst [smem:[#allocation39_spill]] %s4179_s14  ;;  %s473_s24 = sshll.u32 %s3176_s18, 4  ;;  %s474_s24 = int_to_ptr.vmem [resolvable:$true] %s473_s24 }
  0x3d   : > { %p3425_p7 = pnand %p2476_p9, %p4125_p6  ;;  %s4183_s1 = sld [smem:[#allocation41_spill]] }
  0x3f   : > { %p2622_p4 = pneg %p3425_p7 }
  0x43   : > { %s2620_s16 = scalar_lea.hbm %s4183_s1, 128 }
  0x44   : > { %p2621_p1 = scmp.ne.s32.totalorder %s4183_s1, %s2620_s16  ;;  %p2627_p5 = scmp.lt.u32.totalorder %s2620_s16, %s4183_s1 }
  0x46   : > { %p2623_p11 = pnand %p2622_p4, %p2621_p1 }
  0x48   : > { %p2624_p0 = pneg %p2623_p11 }
  0x4a   : > { %p2629_p8 = pnand %p2627_p5, %p2624_p0 }
  0x4c   : > { %2632 = shalt.err (!%p2629_p8)
}
  0x4d   : > { %s2633_s9 = scalar_lea.vmem %s474_s24, 128  ;;  %p2641_p3 = scmp.lt.s32.totalorder %s474_s24, %s474_s24 }
  0x4e   : > { %p2634_p9 = scmp.ne.s32.totalorder %s474_s24, %s2633_s9  ;;  %p2642_p13 = scmp.lt.s32.totalorder %s2633_s9, %s2633_s9 }
  0x50   : > { %p2636_p6 = pnand %p2634_p9, %p2622_p4  ;;  %p2643_p2 = por %p2642_p13, %p2641_p3 }
  0x52   : > { %p2637_p10 = pneg %p2636_p6 }
  0x54   : > { %p2644_p12 = pnand %p2643_p2, %p2637_p10 }
  0x56   : > { %2647 = shalt.err (!%p2644_p12)
}
  0x57   : > { %2479 = dma.hbm_to_vmem [thread:$0]  (!%p3425_p7), %s4183_s1, 128, %s474_s24, [#allocation7]  }
  0x58   : > { %p2219_p1 = scmp.ge.s32.totalorder %s3174_s28, 4 }
  0x59   : > { %s484_s16 = sand.u32 (!%p2219_p1), 1, %s3174_s28   ;;  %s4130_s17 = sand.u32 (!%p2219_p1), 1, %s3154_s23  }
  0x5a   : > { %480 = sbr.rel (%p2219_p1) target bundleno = 458 (0x1ca), region = 20  ;;  %s2220_s9 = sshll.u32 (!%p2219_p1), %s4130_s17, 3 }
  0x5b   : > { %s2221_s12 = sshll.u32 (!%p2219_p1), %s3170_s27, 7  ;;  %s4184_s0 = sld [smem:[#allocation40_spill]] (!%p2219_p1) }
  0x5c   : > { %s488_s24 = scalar_lea.vmem (!%p2219_p1), [#allocation3], %s2220_s9  ;;  %s3456_s21 = scalar_lea.sflag (!%p2219_p1), [#allocation4], %s484_s16 }
  0x5d   : > { %s495_s11 = sshll.u32 (!%p2219_p1), %s488_s24, 4  ;;  %p4185_p6 = scmp.ne.s32.totalorder (!%p2219_p1), %s4166_s25, 0  ;;  %s496_s11 = int_to_ptr.vmem [resolvable:$true] %s495_s11 }
  0x61   : > { %s3454_s30 = scalar_lea.hbm %s4184_s0, %s2221_s12  ;;  %s2652_s14 = scalar_lea.hbm %s4184_s0, 256 }
  0x62   : > { %s2648_s1 = scalar_lea.hbm %s3454_s30, 128  ;;  %p2653_p10 = scmp.lt.u32.totalorder %s3454_s30, %s4184_s0 }
  0x63   : > { %p2649_p3 = scmp.ne.s32.totalorder %s3454_s30, %s2648_s1  ;;  %p2654_p2 = scmp.lt.u32.totalorder %s2652_s14, %s2648_s1 }
  0x64   : > { %p2656_p4 = scmp.lt.u32.totalorder %s2648_s1, %s3454_s30 }
  0x65   : > { %p2650_p12 = pnand %p2649_p3, %p4185_p6  ;;  %p2655_p7 = por %p2654_p2, %p2653_p10 }
  0x67   : > { %p2651_p13 = pneg %p2650_p12  ;;  %p2657_p11 = por %p2656_p4, %p2655_p7 }
  0x69   : > { %p2658_p0 = pnand %p2657_p11, %p2651_p13 }
  0x6b   : > { %2661 = shalt.err (!%p2658_p0)
}
  0x6c   : > { %s2662_s16 = scalar_lea.vmem %s496_s11, 128  ;;  %s3177_s9 = smov [#allocation3]  }
  0x6d   : > { %p2663_p5 = scmp.ne.s32.totalorder %s496_s11, %s2662_s16  ;;  %s2666_s24 = sshll.u32 %s3177_s9, 4  ;;  %s2667_s24 = int_to_ptr.vmem [resolvable:$false] %s2666_s24 }
  0x6e   : > { %s2668_s28 = scalar_lea.vmem %s2667_s24, 256  ;;  %p2669_p1 = scmp.lt.s32.totalorder %s496_s11, %s2667_s24 }
  0x6f   : > { %p2664_p8 = pnand %p2663_p5, %p4185_p6  ;;  %p2670_p3 = scmp.lt.s32.totalorder %s2668_s28, %s2662_s16 }
  0x71   : > { %p2665_p9 = pneg %p2664_p8  ;;  %p2671_p12 = por %p2670_p3, %p2669_p1 }
  0x73   : > { %p2672_p2 = pnand %p2671_p12, %p2665_p9 }
  0x75   : > { %2675 = shalt.err (!%p2672_p2)
}
  0x76   : > { %2444 = dma.hbm_to_vmem [thread:$0]  (%p4185_p6), %s3454_s30, 128, %s496_s11, %s3456_s21  }
  0x77   : > { %s2222_s1 = sshll.u32 %s3170_s27, 4  ;;  %s4186_s17 = sand.u32 1, %s3154_s23  }
  0x78   : > { %s505_s14 = scalar_lea.vmem [#allocation8], %s4186_s17  ;;  %s4187_s2 = sld [smem:[#allocation42_spill]] }
  0x79   : > { %s512_s12 = sshll.u32 %s505_s14, 4  ;;  %s513_s12 = int_to_ptr.vmem [resolvable:$true] %s512_s12 }
  0x7e   : > { %s510_s24 = scalar_lea.hbm %s4187_s2, %s2222_s1  ;;  %s2680_s19 = scalar_lea.hbm %s4187_s2, 32 }
  0x7f   : > { %s2676_s16 = scalar_lea.hbm %s510_s24, 16  ;;  %p2681_p4 = scmp.lt.u32.totalorder %s510_s24, %s4187_s2 }
  0x80   : > { %p2677_p13 = scmp.ne.s32.totalorder %s510_s24, %s2676_s16  ;;  %p2682_p11 = scmp.lt.u32.totalorder %s2680_s19, %s2676_s16 }
  0x81   : > { %p2684_p5 = scmp.lt.u32.totalorder %s2676_s16, %s510_s24 }
  0x82   : > { %p2678_p10 = pnand %p2677_p13, %p4185_p6  ;;  %p2683_p0 = por %p2682_p11, %p2681_p4 }
  0x84   : > { %p2679_p7 = pneg %p2678_p10  ;;  %p2685_p8 = por %p2684_p5, %p2683_p0 }
  0x86   : > { %p2686_p9 = pnand %p2685_p8, %p2679_p7 }
  0x88   : > { %2689 = shalt.err (!%p2686_p9)
}
  0x89   : > { %s2690_s11 = scalar_lea.vmem %s513_s12, 16  ;;  %s3178_s1 = smov [#allocation8]  }
  0x8a   : > { %p2691_p1 = scmp.ne.s32.totalorder %s513_s12, %s2690_s11  ;;  %s2694_s17 = sshll.u32 %s3178_s1, 4  ;;  %s2695_s17 = int_to_ptr.vmem [resolvable:$false] %s2694_s17 }
  0x8b   : > { %s2696_s0 = scalar_lea.vmem %s2695_s17, 32  ;;  %p2697_p2 = scmp.lt.s32.totalorder %s513_s12, %s2695_s17 }
  0x8c   : > { %p2692_p3 = pnand %p2691_p1, %p4185_p6  ;;  %p2698_p13 = scmp.lt.s32.totalorder %s2696_s0, %s2690_s11 }
  0x8e   : > { %p2693_p12 = pneg %p2692_p3  ;;  %p2699_p10 = por %p2698_p13, %p2697_p2 }
  0x90   : > { %p2700_p4 = pnand %p2699_p10, %p2693_p12 }
  0x92   : > { %2703 = shalt.err (!%p2700_p4)
}
  0x93   : > { %2445 = dma.hbm_to_vmem [thread:$0]  (%p4185_p6), %s510_s24, 16, %s513_s12, %s3456_s21  }
  0x94   : > { %s3496_s13 = sand.u32 1, %s3142_s20   ;;  %s4137_s19 = sshll.u32 %s3166_s26, 8 }
  0x95   : > { %s4136_s14 = sshll.u32 %s3496_s13, 4  ;;  %s4188_s3 = sld [smem:[#allocation43_spill]] }
  0x96   : > { %s523_s25 = scalar_lea.vmem [#allocation9], %s4136_s14  ;;  %p4189_p7 = scmp.ne.s32.totalorder %s4172_s10, 0 }
  0x97   : > { %s530_s28 = sshll.u32 %s523_s25, 4  ;;  %s3509_s28 = int_to_ptr.vmem [resolvable:$true] %s530_s28 }
  0x9b   : > { %s3505_s16 = scalar_lea.hbm %s4188_s3, %s4137_s19  ;;  %s2708_s11 = scalar_lea.hbm %s4188_s3, 512 }
  0x9c   : > { %s2704_s12 = scalar_lea.hbm %s3505_s16, 256  ;;  %p2709_p5 = scmp.lt.u32.totalorder %s3505_s16, %s4188_s3 }
  0x9d   : > { %p2705_p6 = scmp.ne.s32.totalorder %s3505_s16, %s2704_s12  ;;  %p2710_p8 = scmp.lt.u32.totalorder %s2708_s11, %s2704_s12 }
  0x9e   : > { %p2712_p1 = scmp.lt.u32.totalorder %s2704_s12, %s3505_s16 }
  0x9f   : > { %p2706_p11 = pnand %p2705_p6, %p4189_p7  ;;  %p2711_p9 = por %p2710_p8, %p2709_p5 }
  0xa1   : > { %p2707_p0 = pneg %p2706_p11  ;;  %p2713_p3 = por %p2712_p1, %p2711_p9 }
  0xa3   : > { %p2714_p12 = pnand %p2713_p3, %p2707_p0 }
  0xa5   : > { %2717 = shalt.err (!%p2714_p12)
}
  0xa6   : > { %s2718_s0 = scalar_lea.vmem %s3509_s28, 256  ;;  %s3179_s18 = smov [#allocation9]  }
  0xa7   : > { %p2719_p2 = scmp.ne.s32.totalorder %s3509_s28, %s2718_s0  ;;  %s2722_s9 = sshll.u32 %s3179_s18, 4  ;;  %s2723_s9 = int_to_ptr.vmem [resolvable:$false] %s2722_s9 }
  0xa8   : > { %s2724_s25 = scalar_lea.vmem %s2723_s9, 512  ;;  %p2725_p4 = scmp.lt.s32.totalorder %s3509_s28, %s2723_s9 }
  0xa9   : > { %p2720_p13 = pnand %p2719_p2, %p4189_p7  ;;  %p2726_p6 = scmp.lt.s32.totalorder %s2724_s25, %s2718_s0 }
  0xab   : > { %p2721_p10 = pneg %p2720_p13  ;;  %p2727_p11 = por %p2726_p6, %p2725_p4 }
  0xad   : > { %p2728_p5 = pnand %p2727_p11, %p2721_p10 }
  0xaf   : > { %2731 = shalt.err (!%p2728_p5)
}
  0xb0   : > { %s4138_s12 = smov 64   ;;  %s4140_s24 = smov 4  }
  0xb1   : > { %2446 = dma.hbm_to_vmem [thread:$0]  (%p4189_p7), %s3505_s16, 256, %s3509_s28, %s3456_s21, %s4138_s12, %s4138_s12, %s4140_s24  }
  0xb2   : > { %s3537_s30 = sshll.u32 %s3166_s26, 4  ;;  %s543_s11 = scalar_lea.vmem [#allocation10], %s3496_s13 }
  0xb3   : > { %s550_s1 = sshll.u32 %s543_s11, 4  ;;  %s4190_s4 = sld [smem:[#allocation44_spill]]  ;;  %s551_s1 = int_to_ptr.vmem [resolvable:$true] %s550_s1 }
  0xb9   : > { %s548_s18 = scalar_lea.hbm %s4190_s4, %s3537_s30  ;;  %s2736_s19 = scalar_lea.hbm %s4190_s4, 32 }
  0xba   : > { %s2732_s9 = scalar_lea.hbm %s548_s18, 16  ;;  %p2737_p1 = scmp.lt.u32.totalorder %s548_s18, %s4190_s4 }
  0xbb   : > { %p2733_p0 = scmp.ne.s32.totalorder %s548_s18, %s2732_s9  ;;  %p2738_p3 = scmp.lt.u32.totalorder %s2736_s19, %s2732_s9 }
  0xbc   : > { %p2740_p2 = scmp.lt.u32.totalorder %s2732_s9, %s548_s18 }
  0xbd   : > { %p2734_p8 = pnand %p2733_p0, %p4189_p7  ;;  %p2739_p12 = por %p2738_p3, %p2737_p1 }
  0xbf   : > { %p2735_p9 = pneg %p2734_p8  ;;  %p2741_p13 = por %p2740_p2, %p2739_p12 }
  0xc1   : > { %p2742_p10 = pnand %p2741_p13, %p2735_p9 }
  0xc3   : > { %2745 = shalt.err (!%p2742_p10)
}
  0xc4   : > { %s2746_s11 = scalar_lea.vmem %s551_s1, 16  ;;  %s3182_s17 = smov [#allocation10]  }
  0xc5   : > { %p2747_p4 = scmp.ne.s32.totalorder %s551_s1, %s2746_s11  ;;  %s2750_s0 = sshll.u32 %s3182_s17, 4  ;;  %s2751_s0 = int_to_ptr.vmem [resolvable:$false] %s2750_s0 }
  0xc6   : > { %s2752_s14 = scalar_lea.vmem %s2751_s0, 32  ;;  %p2753_p5 = scmp.lt.s32.totalorder %s551_s1, %s2751_s0 }
  0xc7   : > { %p2748_p6 = pnand %p2747_p4, %p4189_p7  ;;  %p2754_p0 = scmp.lt.s32.totalorder %s2752_s14, %s2746_s11 }
  0xc9   : > { %p2749_p11 = pneg %p2748_p6  ;;  %p2755_p8 = por %p2754_p0, %p2753_p5 }
  0xcb   : > { %p2756_p1 = pnand %p2755_p8, %p2749_p11 }
  0xcd   : > { %2759 = shalt.err (!%p2756_p1)
}
  0xce   : > { %2447 = dma.hbm_to_vmem [thread:$0]  (%p4189_p7), %s548_s18, 16, %s551_s1, %s3456_s21  }
  0xcf   : > { %s4191_s19 = sshll.u32 %s3166_s26, 8  ;;  %s4192_s5 = sld [smem:[#allocation45_spill]] }
  0xd0   : > { %s4193_s28 = sshll.u32 %s3496_s13, 4  ;;  %s4194_s6 = sld [smem:[#allocation46_spill]] }
  0xd1   : > { %s561_s11 = scalar_lea.vmem [#allocation11], %s4193_s28 }
  0xd2   : > { %s568_s17 = sshll.u32 %s561_s11, 4  ;;  %s3566_s17 = int_to_ptr.vmem [resolvable:$true] %s568_s17 }
  0xd5   : > { %s3562_s16 = scalar_lea.hbm %s4192_s5, %s4191_s19  ;;  %s2764_s9 = scalar_lea.hbm %s4192_s5, 512 }
  0xd6   : > { %s3572_s12 = scalar_lea.hbm %s4194_s6, %s3537_s30  ;;  %s2760_s1 = scalar_lea.hbm %s3562_s16, 256 }
  0xd7   : > { %p2761_p9 = scmp.ne.s32.totalorder %s3562_s16, %s2760_s1  ;;  %p2765_p2 = scmp.lt.u32.totalorder %s3562_s16, %s4192_s5 }
  0xd8   : > { %p2766_p13 = scmp.lt.u32.totalorder %s2764_s9, %s2760_s1  ;;  %p2768_p4 = scmp.lt.u32.totalorder %s2760_s1, %s3562_s16 }
  0xd9   : > { %p2762_p3 = pnand %p2761_p9, %p4189_p7 }
  0xda   : > { %p2767_p10 = por %p2766_p13, %p2765_p2 }
  0xdb   : > { %p2763_p12 = pneg %p2762_p3 }
  0xdc   : > { %p2769_p6 = por %p2768_p4, %p2767_p10 }
  0xde   : > { %p2770_p11 = pnand %p2769_p6, %p2763_p12 }
  0xe0   : > { %2773 = shalt.err (!%p2770_p11)
}
  0xe1   : > { %s2774_s28 = scalar_lea.vmem %s3566_s17, 256  ;;  %s3183_s11 = smov [#allocation11]  }
  0xe2   : > { %p2775_p5 = scmp.ne.s32.totalorder %s3566_s17, %s2774_s28  ;;  %s2778_s0 = sshll.u32 %s3183_s11, 4  ;;  %s2779_s0 = int_to_ptr.vmem [resolvable:$false] %s2778_s0 }
  0xe3   : > { %s2780_s24 = scalar_lea.vmem %s2779_s0, 512  ;;  %p2781_p1 = scmp.lt.s32.totalorder %s3566_s17, %s2779_s0 }
  0xe4   : > { %p2776_p0 = pnand %p2775_p5, %p4189_p7  ;;  %p2782_p9 = scmp.lt.s32.totalorder %s2780_s24, %s2774_s28 }
  0xe6   : > { %p2777_p8 = pneg %p2776_p0  ;;  %p2783_p3 = por %p2782_p9, %p2781_p1 }
  0xe8   : > { %p2784_p2 = pnand %p2783_p3, %p2777_p8 }
  0xea   : > { %2787 = shalt.err (!%p2784_p2)
}
  0xeb   : > { %s4195_s14 = smov 4   ;;  %s4196_s1 = smov 64  }
  0xec   : > { %2448 = dma.hbm_to_vmem [thread:$0]  (%p4189_p7), %s3562_s16, 256, %s3566_s17, %s3456_s21, %s4196_s1, %s4196_s1, %s4195_s14  }
  0xed   : > { %s581_s18 = scalar_lea.vmem [#allocation12], %s3496_s13  ;;  %s4197_s7 = sld [smem:[#allocation47_spill]] }
  0xee   : > { %s588_s19 = sshll.u32 %s581_s18, 4  ;;  %s2788_s11 = scalar_lea.hbm %s3572_s12, 16  ;;  %s589_s19 = int_to_ptr.vmem [resolvable:$true] %s588_s19 }
  0xef   : > { %p2789_p12 = scmp.ne.s32.totalorder %s3572_s12, %s2788_s11  ;;  %s2792_s2 = scalar_lea.hbm %s4194_s6, 32 }
  0xf0   : > { %p2793_p4 = scmp.lt.u32.totalorder %s3572_s12, %s4194_s6  ;;  %p2794_p6 = scmp.lt.u32.totalorder %s2792_s2, %s2788_s11 }
  0xf1   : > { %p2790_p13 = pnand %p2789_p12, %p4189_p7  ;;  %p2796_p5 = scmp.lt.u32.totalorder %s2788_s11, %s3572_s12 }
  0xf2   : > { %p2795_p11 = por %p2794_p6, %p2793_p4 }
  0xf3   : > { %s3604_s28 = scalar_lea.hbm %s4197_s7, %s3537_s30  ;;  %p2791_p10 = pneg %p2790_p13 }
  0xf4   : > { %p2797_p0 = por %p2796_p5, %p2795_p11 }
  0xf6   : > { %p2798_p8 = pnand %p2797_p0, %p2791_p10 }
  0xf8   : > { %2801 = shalt.err (!%p2798_p8)
}
  0xf9   : > { %s2802_s16 = scalar_lea.vmem %s589_s19, 16  ;;  %s3184_s17 = smov [#allocation12]  }
  0xfa   : > { %p2803_p1 = scmp.ne.s32.totalorder %s589_s19, %s2802_s16  ;;  %s2806_s18 = sshll.u32 %s3184_s17, 4  ;;  %s2807_s18 = int_to_ptr.vmem [resolvable:$false] %s2806_s18 }
  0xfb   : > { %s2808_s9 = scalar_lea.vmem %s2807_s18, 32  ;;  %p2809_p2 = scmp.lt.s32.totalorder %s589_s19, %s2807_s18 }
  0xfc   : > { %p2804_p9 = pnand %p2803_p1, %p4189_p7  ;;  %p2810_p12 = scmp.lt.s32.totalorder %s2808_s9, %s2802_s16 }
  0xfe   : > { %p2805_p3 = pneg %p2804_p9  ;;  %p2811_p13 = por %p2810_p12, %p2809_p2 }
 0x100   : > { %p2812_p4 = pnand %p2811_p13, %p2805_p3 }
 0x102   : > { %2815 = shalt.err (!%p2812_p4)
}
 0x103   : > { %2449 = dma.hbm_to_vmem [thread:$0]  (%p4189_p7), %s3572_s12, 16, %s589_s19, %s3456_s21  }
 0x104   : > { %s598_s2 = scalar_lea.vmem [#allocation13], %s3496_s13  ;;  %s4198_s8 = sld [smem:[#allocation48_spill]] }
 0x105   : > { %s605_s3 = sshll.u32 %s598_s2, 4  ;;  %s2816_s0 = scalar_lea.hbm %s3604_s28, 16  ;;  %s606_s3 = int_to_ptr.vmem [resolvable:$true] %s605_s3 }
 0x106   : > { %p2817_p10 = scmp.ne.s32.totalorder %s3604_s28, %s2816_s0  ;;  %s2820_s17 = scalar_lea.hbm %s4197_s7, 32 }
 0x107   : > { %p2821_p5 = scmp.lt.u32.totalorder %s3604_s28, %s4197_s7  ;;  %p2822_p0 = scmp.lt.u32.totalorder %s2820_s17, %s2816_s0 }
 0x108   : > { %p2818_p6 = pnand %p2817_p10, %p4189_p7  ;;  %p2824_p1 = scmp.lt.u32.totalorder %s2816_s0, %s3604_s28 }
 0x109   : > { %p2823_p8 = por %p2822_p0, %p2821_p5 }
 0x10a   : > { %s3629_s11 = scalar_lea.hbm %s4198_s8, %s3537_s30  ;;  %p2819_p11 = pneg %p2818_p6 }
 0x10b   : > { %p2825_p9 = por %p2824_p1, %p2823_p8 }
 0x10d   : > { %p2826_p3 = pnand %p2825_p9, %p2819_p11 }
 0x10f   : > { %2829 = shalt.err (!%p2826_p3)
}
 0x110   : > { %s2830_s12 = scalar_lea.vmem %s606_s3, 16  ;;  %s3185_s19 = smov [#allocation13]  }
 0x111   : > { %p2831_p2 = scmp.ne.s32.totalorder %s606_s3, %s2830_s12  ;;  %s2834_s2 = sshll.u32 %s3185_s19, 4  ;;  %s2835_s2 = int_to_ptr.vmem [resolvable:$false] %s2834_s2 }
 0x112   : > { %s2836_s4 = scalar_lea.vmem %s2835_s2, 32  ;;  %p2837_p4 = scmp.lt.s32.totalorder %s606_s3, %s2835_s2 }
 0x113   : > { %p2832_p12 = pnand %p2831_p2, %p4189_p7  ;;  %p2838_p10 = scmp.lt.s32.totalorder %s2836_s4, %s2830_s12 }
 0x115   : > { %p2833_p13 = pneg %p2832_p12  ;;  %p2839_p6 = por %p2838_p10, %p2837_p4 }
 0x117   : > { %p2840_p0 = pnand %p2839_p6, %p2833_p13 }
 0x119   : > { %2843 = shalt.err (!%p2840_p0)
}
 0x11a   : > { %2450 = dma.hbm_to_vmem [thread:$0]  (%p4189_p7), %s3604_s28, 16, %s606_s3, %s3456_s21  }
 0x11b   : > { %s615_s25 = scalar_lea.vmem [#allocation14], %s3496_s13  ;;  %s2436_s24 = smul.u32 48, %s3496_s13 }
 0x11c   : > { %s622_s0 = sshll.u32 %s615_s25, 4  ;;  %s2437_s16 = smul.u32 768, %s3166_s26  ;;  %s623_s0 = int_to_ptr.vmem [resolvable:$true] %s622_s0 }
 0x11d   : > { %s2844_s17 = scalar_lea.hbm %s3629_s11, 16  ;;  %s2848_s12 = scalar_lea.hbm %s4198_s8, 32 }
 0x11e   : > { %p2845_p11 = scmp.ne.s32.totalorder %s3629_s11, %s2844_s17  ;;  %p2849_p1 = scmp.lt.u32.totalorder %s3629_s11, %s4198_s8 }
 0x11f   : > { %p2850_p9 = scmp.lt.u32.totalorder %s2848_s12, %s2844_s17  ;;  %p2852_p2 = scmp.lt.u32.totalorder %s2844_s17, %s3629_s11 }
 0x120   : > { %p2846_p5 = pnand %p2845_p11, %p4189_p7 }
 0x121   : > { %p2851_p3 = por %p2850_p9, %p2849_p1 }
 0x122   : > { %p2847_p8 = pneg %p2846_p5 }
 0x123   : > { %p2853_p12 = por %p2852_p2, %p2851_p3 }
 0x125   : > { %p2854_p13 = pnand %p2853_p12, %p2847_p8 }
 0x127   : > { %2857 = shalt.err (!%p2854_p13)
}
 0x128   : > { %s2858_s28 = scalar_lea.vmem %s623_s0, 16  ;;  %s3186_s3 = smov [#allocation14]  }
 0x129   : > { %p2859_p4 = scmp.ne.s32.totalorder %s623_s0, %s2858_s28  ;;  %s2862_s4 = sshll.u32 %s3186_s3, 4  ;;  %s2863_s4 = int_to_ptr.vmem [resolvable:$false] %s2862_s4 }
 0x12a   : > { %s2864_s25 = scalar_lea.vmem %s2863_s4, 32  ;;  %p2865_p0 = scmp.lt.s32.totalorder %s623_s0, %s2863_s4 }
 0x12b   : > { %p2860_p10 = pnand %p2859_p4, %p4189_p7  ;;  %p2866_p11 = scmp.lt.s32.totalorder %s2864_s25, %s2858_s28 }
 0x12d   : > { %p2861_p6 = pneg %p2860_p10  ;;  %p2867_p5 = por %p2866_p11, %p2865_p0 }
 0x12f   : > { %p2868_p1 = pnand %p2867_p5, %p2861_p6 }
 0x131   : > { %2871 = shalt.err (!%p2868_p1)
}
 0x132   : > { %2451 = dma.hbm_to_vmem [thread:$0]  (%p4189_p7), %s3629_s11, 16, %s623_s0, %s3456_s21  }
 0x133   : > { %s4199_s9 = sld [smem:[#allocation49_spill]]  ;;  %s633_s19 = scalar_lea.vmem [#allocation15], %s2436_s24 }
 0x134   : > { %s640_s2 = sshll.u32 %s633_s19, 4  ;;  %s4200_s4 = sld [smem:[#allocation50_spill]]  ;;  %s3677_s2 = int_to_ptr.vmem [resolvable:$true] %s640_s2 }
 0x139   : > { %s3673_s12 = scalar_lea.hbm %s4199_s9, %s2437_s16  ;;  %s2876_s17 = scalar_lea.hbm %s4199_s9, 1536 }
 0x13a   : > { %s3683_s25 = scalar_lea.hbm %s4200_s4, %s3537_s30  ;;  %s2872_s11 = scalar_lea.hbm %s3673_s12, 768 }
 0x13b   : > { %p2873_p8 = scmp.ne.s32.totalorder %s3673_s12, %s2872_s11  ;;  %p2877_p2 = scmp.lt.u32.totalorder %s3673_s12, %s4199_s9 }
 0x13c   : > { %p2878_p12 = scmp.lt.u32.totalorder %s2876_s17, %s2872_s11  ;;  %p2880_p4 = scmp.lt.u32.totalorder %s2872_s11, %s3673_s12 }
 0x13d   : > { %p2874_p9 = pnand %p2873_p8, %p4189_p7 }
 0x13e   : > { %p2879_p13 = por %p2878_p12, %p2877_p2 }
 0x13f   : > { %p2875_p3 = pneg %p2874_p9 }
 0x140   : > { %p2881_p10 = por %p2880_p4, %p2879_p13 }
 0x142   : > { %p2882_p6 = pnand %p2881_p10, %p2875_p3 }
 0x144   : > { %2885 = shalt.err (!%p2882_p6)
}
 0x145   : > { %s2886_s24 = scalar_lea.vmem %s3677_s2, 768  ;;  %s3187_s19 = smov [#allocation15]  }
 0x146   : > { %p2887_p0 = scmp.ne.s32.totalorder %s3677_s2, %s2886_s24  ;;  %s2890_s28 = sshll.u32 %s3187_s19, 4  ;;  %s2891_s28 = int_to_ptr.vmem [resolvable:$false] %s2890_s28 }
 0x147   : > { %s2892_s5 = scalar_lea.vmem %s2891_s28, 1536  ;;  %p2893_p1 = scmp.lt.s32.totalorder %s3677_s2, %s2891_s28 }
 0x148   : > { %p2888_p11 = pnand %p2887_p0, %p4189_p7  ;;  %p2894_p8 = scmp.lt.s32.totalorder %s2892_s5, %s2886_s24 }
 0x14a   : > { %p2889_p5 = pneg %p2888_p11  ;;  %p2895_p9 = por %p2894_p8, %p2893_p1 }
 0x14c   : > { %p2896_p2 = pnand %p2895_p9, %p2889_p5 }
 0x14e   : > { %2899 = shalt.err (!%p2896_p2)
}
 0x14f   : > { %2452 = dma.hbm_to_vmem [thread:$0]  (%p4189_p7), %s3673_s12, 768, %s3677_s2, %s3456_s21, %s4196_s1, %s4196_s1, %s4195_s14  }
 0x150   : > { %s653_s3 = scalar_lea.vmem [#allocation16], %s3496_s13  ;;  %s2438_s0 = smul.u32 96, %s3496_s13 }
 0x151   : > { %s660_s11 = sshll.u32 %s653_s3, 4  ;;  %s2439_s16 = smul.u32 1536, %s3166_s26  ;;  %s661_s11 = int_to_ptr.vmem [resolvable:$true] %s660_s11 }
 0x152   : > { %s2900_s17 = scalar_lea.hbm %s3683_s25, 16  ;;  %s2904_s19 = scalar_lea.hbm %s4200_s4, 32 }
 0x153   : > { %p2901_p3 = scmp.ne.s32.totalorder %s3683_s25, %s2900_s17  ;;  %p2905_p4 = scmp.lt.u32.totalorder %s3683_s25, %s4200_s4 }
 0x154   : > { %p2906_p10 = scmp.lt.u32.totalorder %s2904_s19, %s2900_s17  ;;  %p2908_p0 = scmp.lt.u32.totalorder %s2900_s17, %s3683_s25 }
 0x155   : > { %p2902_p12 = pnand %p2901_p3, %p4189_p7 }
 0x156   : > { %p2907_p6 = por %p2906_p10, %p2905_p4 }
 0x157   : > { %p2903_p13 = pneg %p2902_p12 }
 0x158   : > { %p2909_p11 = por %p2908_p0, %p2907_p6 }
 0x15a   : > { %p2910_p5 = pnand %p2909_p11, %p2903_p13 }
 0x15c   : > { %2913 = shalt.err (!%p2910_p5)
}
 0x15d   : > { %s2914_s12 = scalar_lea.vmem %s661_s11, 16  ;;  %s3188_s2 = smov [#allocation16]  }
 0x15e   : > { %p2915_p1 = scmp.ne.s32.totalorder %s661_s11, %s2914_s12  ;;  %s2918_s3 = sshll.u32 %s3188_s2, 4  ;;  %s2919_s3 = int_to_ptr.vmem [resolvable:$false] %s2918_s3 }
 0x15f   : > { %s2920_s18 = scalar_lea.vmem %s2919_s3, 32  ;;  %p2921_p2 = scmp.lt.s32.totalorder %s661_s11, %s2919_s3 }
 0x160   : > { %p2916_p8 = pnand %p2915_p1, %p4189_p7  ;;  %p2922_p3 = scmp.lt.s32.totalorder %s2920_s18, %s2914_s12 }
 0x162   : > { %p2917_p9 = pneg %p2916_p8  ;;  %p2923_p12 = por %p2922_p3, %p2921_p2 }
 0x164   : > { %p2924_p4 = pnand %p2923_p12, %p2917_p9 }
 0x166   : > { %2927 = shalt.err (!%p2924_p4)
}
 0x167   : > { %2453 = dma.hbm_to_vmem [thread:$0]  (%p4189_p7), %s3683_s25, 16, %s661_s11, %s3456_s21  }
 0x168   : > { %s4201_s19 = sld [smem:[#allocation51_spill]]  ;;  %s671_s12 = scalar_lea.vmem [#allocation17], %s2438_s0 }
 0x169   : > { %s678_s2 = sshll.u32 %s671_s12, 4  ;;  %s4203_s4 = sld [smem:[#allocation52_spill]]  ;;  %s3738_s2 = int_to_ptr.vmem [resolvable:$true] %s678_s2 }
 0x16e   : > { %s4202_s5 = smov %s4201_s19  ;;  %s3734_s28 = scalar_lea.hbm %s4201_s19, %s2439_s16 }
 0x16f   : > { %s3744_s6 = scalar_lea.hbm %s4203_s4, %s3537_s30  ;;  %s2928_s25 = scalar_lea.hbm %s3734_s28, 1536 }
 0x170   : > { %p2929_p13 = scmp.ne.s32.totalorder %s3734_s28, %s2928_s25  ;;  %s2932_s17 = scalar_lea.hbm %s4202_s5, 3072 }
 0x171   : > { %p2933_p0 = scmp.lt.u32.totalorder %s3734_s28, %s4202_s5  ;;  %p2934_p11 = scmp.lt.u32.totalorder %s2932_s17, %s2928_s25 }
 0x172   : > { %p2930_p10 = pnand %p2929_p13, %p4189_p7  ;;  %p2936_p1 = scmp.lt.u32.totalorder %s2928_s25, %s3734_s28 }
 0x173   : > { %p2935_p5 = por %p2934_p11, %p2933_p0 }
 0x174   : > { %p2931_p6 = pneg %p2930_p10 }
 0x175   : > { %p2937_p8 = por %p2936_p1, %p2935_p5 }
 0x177   : > { %p2938_p9 = pnand %p2937_p8, %p2931_p6 }
 0x179   : > { %2941 = shalt.err (!%p2938_p9)
}
 0x17a   : > { %s2942_s0 = scalar_lea.vmem %s3738_s2, 1536  ;;  %s3189_s12 = smov [#allocation17]  }
 0x17b   : > { %p2943_p2 = scmp.ne.s32.totalorder %s3738_s2, %s2942_s0  ;;  %s2946_s3 = sshll.u32 %s3189_s12, 4  ;;  %s2947_s3 = int_to_ptr.vmem [resolvable:$false] %s2946_s3 }
 0x17c   : > { %s2948_s18 = scalar_lea.vmem %s2947_s3, 3072  ;;  %p2949_p4 = scmp.lt.s32.totalorder %s3738_s2, %s2947_s3 }
 0x17d   : > { %p2944_p3 = pnand %p2943_p2, %p4189_p7  ;;  %p2950_p13 = scmp.lt.s32.totalorder %s2948_s18, %s2942_s0 }
 0x17f   : > { %p2945_p12 = pneg %p2944_p3  ;;  %p2951_p10 = por %p2950_p13, %p2949_p4 }
 0x181   : > { %p2952_p0 = pnand %p2951_p10, %p2945_p12 }
 0x183   : > { %2955 = shalt.err (!%p2952_p0)
}
 0x184   : > { %2454 = dma.hbm_to_vmem [thread:$0]  (%p4189_p7), %s3734_s28, 1536, %s3738_s2, %s3456_s21, %s4196_s1, %s4196_s1, %s4195_s14  }
 0x185   : > { %s691_s25 = scalar_lea.vmem [#allocation18], %s3496_s13  ;;  %s4204_s24 = sld [smem:[#allocation53_spill]] }
 0x186   : > { %s698_s11 = sshll.u32 %s691_s25, 4  ;;  %s2956_s12 = scalar_lea.hbm %s3744_s6, 16  ;;  %s699_s11 = int_to_ptr.vmem [resolvable:$true] %s698_s11 }
 0x187   : > { %p2957_p6 = scmp.ne.s32.totalorder %s3744_s6, %s2956_s12  ;;  %s2960_s5 = scalar_lea.hbm %s4203_s4, 32 }
 0x188   : > { %p2961_p1 = scmp.lt.u32.totalorder %s3744_s6, %s4203_s4  ;;  %p2962_p8 = scmp.lt.u32.totalorder %s2960_s5, %s2956_s12 }
 0x189   : > { %p2958_p11 = pnand %p2957_p6, %p4189_p7  ;;  %p2964_p2 = scmp.lt.u32.totalorder %s2956_s12, %s3744_s6 }
 0x18a   : > { %p2963_p9 = por %p2962_p8, %p2961_p1 }
 0x18b   : > { %s4205_s0 = smov %s4204_s24  ;;  %s3776_s19 = scalar_lea.hbm %s4204_s24, %s3537_s30 }
 0x18c   : > { %p2959_p5 = pneg %p2958_p11  ;;  %p2965_p3 = por %p2964_p2, %p2963_p9 }
 0x18e   : > { %p2966_p12 = pnand %p2965_p3, %p2959_p5 }
 0x190   : > { %2969 = shalt.err (!%p2966_p12)
}
 0x191   : > { %s2970_s14 = scalar_lea.vmem %s699_s11, 16  ;;  %s3190_s1 = smov [#allocation18]  }
 0x192   : > { %p2971_p4 = scmp.ne.s32.totalorder %s699_s11, %s2970_s14  ;;  %s2974_s28 = sshll.u32 %s3190_s1, 4  ;;  %s2975_s28 = int_to_ptr.vmem [resolvable:$false] %s2974_s28 }
 0x193   : > { %s2976_s2 = scalar_lea.vmem %s2975_s28, 32  ;;  %p2977_p0 = scmp.lt.s32.totalorder %s699_s11, %s2975_s28 }
 0x194   : > { %p2972_p13 = pnand %p2971_p4, %p4189_p7  ;;  %p2978_p6 = scmp.lt.s32.totalorder %s2976_s2, %s2970_s14 }
 0x196   : > { %p2973_p10 = pneg %p2972_p13  ;;  %p2979_p11 = por %p2978_p6, %p2977_p0 }
 0x198   : > { %p2980_p1 = pnand %p2979_p11, %p2973_p10 }
 0x19a   : > { %2983 = shalt.err (!%p2980_p1)
}
 0x19b   : > { %2455 = dma.hbm_to_vmem [thread:$0]  (%p4189_p7), %s3744_s6, 16, %s699_s11, %s3456_s21  }
 0x19c   : > { %s708_s7 = scalar_lea.vmem [#allocation19], %s3496_s13  ;;  %s4206_s16 = sld [smem:[#allocation54_spill]] }
 0x19d   : > { %s715_s8 = sshll.u32 %s708_s7, 4  ;;  %s2984_s24 = scalar_lea.hbm %s3776_s19, 16  ;;  %s716_s8 = int_to_ptr.vmem [resolvable:$true] %s715_s8 }
 0x19e   : > { %p2985_p5 = scmp.ne.s32.totalorder %s3776_s19, %s2984_s24  ;;  %s2988_s18 = scalar_lea.hbm %s4205_s0, 32 }
 0x19f   : > { %p2989_p2 = scmp.lt.u32.totalorder %s3776_s19, %s4205_s0  ;;  %p2990_p3 = scmp.lt.u32.totalorder %s2988_s18, %s2984_s24 }
 0x1a0   : > { %p2986_p8 = pnand %p2985_p5, %p4189_p7  ;;  %p2992_p4 = scmp.lt.u32.totalorder %s2984_s24, %s3776_s19 }
 0x1a1   : > { %p2991_p12 = por %p2990_p3, %p2989_p2 }
 0x1a2   : > { %s3801_s17 = scalar_lea.hbm %s4206_s16, %s3537_s30  ;;  %p2987_p9 = pneg %p2986_p8 }
 0x1a3   : > { %p2993_p13 = por %p2992_p4, %p2991_p12 }
 0x1a5   : > { %p2994_p10 = pnand %p2993_p13, %p2987_p9 }
 0x1a7   : > { %2997 = shalt.err (!%p2994_p10)
}
 0x1a8   : > { %s2998_s6 = scalar_lea.vmem %s716_s8, 16  ;;  %s3191_s30 = smov [#allocation19]  }
 0x1a9   : > { %p2999_p0 = scmp.ne.s32.totalorder %s716_s8, %s2998_s6  ;;  %s3002_s11 = sshll.u32 %s3191_s30, 4  ;;  %s3003_s11 = int_to_ptr.vmem [resolvable:$false] %s3002_s11 }
 0x1aa   : > { %s3004_s28 = scalar_lea.vmem %s3003_s11, 32  ;;  %p3005_p1 = scmp.lt.s32.totalorder %s716_s8, %s3003_s11 }
 0x1ab   : > { %p3000_p6 = pnand %p2999_p0, %p4189_p7  ;;  %p3006_p5 = scmp.lt.s32.totalorder %s3004_s28, %s2998_s6 }
 0x1ad   : > { %p3001_p11 = pneg %p3000_p6  ;;  %p3007_p8 = por %p3006_p5, %p3005_p1 }
 0x1af   : > { %p3008_p2 = pnand %p3007_p8, %p3001_p11 }
 0x1b1   : > { %3011 = shalt.err (!%p3008_p2)
}
 0x1b2   : > { %2456 = dma.hbm_to_vmem [thread:$0]  (%p4189_p7), %s3776_s19, 16, %s716_s8, %s3456_s21  }
 0x1b3   : > { %s725_s2 = scalar_lea.vmem [#allocation20], %s3496_s13  ;;  %s3012_s5 = scalar_lea.hbm %s3801_s17, 16 }
 0x1b4   : > { %s732_s7 = sshll.u32 %s725_s2, 4  ;;  %p3013_p9 = scmp.ne.s32.totalorder %s3801_s17, %s3012_s5  ;;  %s733_s7 = int_to_ptr.vmem [resolvable:$true] %s732_s7 }
 0x1b5   : > { %s3016_s12 = scalar_lea.hbm %s4206_s16, 32  ;;  %p3017_p4 = scmp.lt.u32.totalorder %s3801_s17, %s4206_s16 }
 0x1b6   : > { %p3014_p3 = pnand %p3013_p9, %p4189_p7  ;;  %p3018_p13 = scmp.lt.u32.totalorder %s3016_s12, %s3012_s5 }
 0x1b7   : > { %p3020_p0 = scmp.lt.u32.totalorder %s3012_s5, %s3801_s17 }
 0x1b8   : > { %p3015_p12 = pneg %p3014_p3  ;;  %p3019_p10 = por %p3018_p13, %p3017_p4 }
 0x1ba   : > { %p3021_p6 = por %p3020_p0, %p3019_p10 }
 0x1bc   : > { %p3022_p11 = pnand %p3021_p6, %p3015_p12 }
 0x1be   : > { %3025 = shalt.err (!%p3022_p11)
}
 0x1bf   : > { %s3026_s13 = scalar_lea.vmem %s733_s7, 16  ;;  %s3192_s19 = smov [#allocation20]  }
 0x1c0   : > { %p3027_p1 = scmp.ne.s32.totalorder %s733_s7, %s3026_s13  ;;  %s3030_s8 = sshll.u32 %s3192_s19, 4  ;;  %s3031_s8 = int_to_ptr.vmem [resolvable:$false] %s3030_s8 }
 0x1c1   : > { %s3032_s14 = scalar_lea.vmem %s3031_s8, 32  ;;  %p3033_p2 = scmp.lt.s32.totalorder %s733_s7, %s3031_s8 }
 0x1c2   : > { %p3028_p5 = pnand %p3027_p1, %p4189_p7  ;;  %p3034_p9 = scmp.lt.s32.totalorder %s3032_s14, %s3026_s13 }
 0x1c4   : > { %p3029_p8 = pneg %p3028_p5  ;;  %p3035_p3 = por %p3034_p9, %p3033_p2 }
 0x1c6   : > { %p3036_p4 = pnand %p3035_p3, %p3029_p8 }
 0x1c8   : > { %3039 = shalt.err (!%p3036_p4)
}
 0x1c9   : > { %2457 = dma.hbm_to_vmem [thread:$0]  (%p4189_p7), %s3801_s17, 16, %s733_s7, %s3456_s21  }
 0x1ca PF: > { %p4207_p12 = scmp.ne.s32.totalorder %s4181_s15, 0 }
 0x1cb   : > { %s4208_s1 = sld [smem:[#allocation34_spill]] (!%p4207_p12)  ;;  %s743_s6 = sand.u32 (!%p4207_p12), 1, %s3338_s29  }
 0x1cc   : > { %741 = sbr.rel (%p4207_p12) target bundleno = 3066 (0xbfa), region = 80  ;;  %s3844_s30 = sand.u32 (!%p4207_p12), 1, %s3150_s22  }
 0x1cd   : > { %s2240_s11 = sshll.u32 (!%p4207_p12), %s3844_s30, 3  ;;  %s744_s28 = scalar_lea.sflag (!%p4207_p12), [#allocation4], %s743_s6 }
 0x1ce   : > { %s747_s2 = scalar_lea.vmem (!%p4207_p12), [#allocation3], %s2240_s11 }
 0x1d1   : > { %p4209_p13 = scmp.ne.s32.totalorder (!%p4207_p12), %s4208_s1, 0 }
 0x1d3   : > { %3113 = dma.done.wait (%p4209_p13), %s744_s28, 128  }
 0x1d4   : > { %3115 = vsyncadd (%p4209_p13), %s744_s28, 4294967168  ;;  %p4210_p7 = scmp.eq.s32.totalorder %s3338_s29, 0 }
 0x1d6   : > { %3117 = dma.done.wait (%p4210_p7), [#allocation7], 128   ;;  %p4211_p10 = pmov %p4210_p7 }
 0x1d7   : > { %s759_s10 = scalar_lea.vmem [#allocation8], %s3844_s30 }
 0x1d8   : > { %3119 = vsyncadd (%p4211_p10), [#allocation7], 4294967168 }
 0x1d9   : > { %3121 = dma.done.wait (%p4209_p13), %s744_s28, 16  }
 0x1da   : > { %3123 = vsyncadd (%p4209_p13), %s744_s28, 4294967280  ;;  %s4212_s15 = sld [smem:[#allocation27_spill]]  ;;  %s4213_s21 = sld [smem:[#allocation37_spill]] }
 0x1e0   : > { %s3861_s17 = sand.u32 1, %s4212_s15   ;;  %p4214_p0 = scmp.ne.s32.totalorder %s4213_s21, 0 }
 0x1e1   : > { %s2242_s7 = sshll.u32 %s3861_s17, 4 }
 0x1e2   : > { %s3864_s5 = scalar_lea.vmem [#allocation9], %s2242_s7 }
 0x1e3   : > { %3125 = dma.done.wait (%p4214_p0), %s744_s28, 2944  }
 0x1e4   : > { %3127 = vsyncadd (%p4214_p0), %s744_s28, 4294964352  ;;  %s2440_s29 = smul.u32 48, %s3861_s17  ;;  %s776_s24 = scalar_lea.vmem [#allocation10], %s3861_s17 }
 0x1e5   : > { %s2441_s25 = smul.u32 96, %s3861_s17  ;;  %s3873_s12 = scalar_lea.vmem [#allocation11], %s2242_s7 }
 0x1e6   : > { %s793_s3 = scalar_lea.vmem [#allocation12], %s3861_s17  ;;  %s801_s18 = scalar_lea.vmem [#allocation13], %s3861_s17 }
 0x1e7   : > { %s809_s13 = scalar_lea.vmem [#allocation14], %s3861_s17  ;;  %s3878_s19 = scalar_lea.vmem [#allocation15], %s2440_s29 }
 0x1e8   : > { %s826_s8 = scalar_lea.vmem [#allocation16], %s3861_s17  ;;  %s3881_s14 = scalar_lea.vmem [#allocation17], %s2441_s25 }
 0x1e9   : > { %s843_s1 = scalar_lea.vmem [#allocation18], %s3861_s17  ;;  %s851_s6 = scalar_lea.vmem [#allocation19], %s3861_s17 }
 0x1ea   : > { %s859_s28 = scalar_lea.vmem [#allocation20], %s3861_s17  ;;  %s3886_s15 = scalar_lea.vmem [#allocation21], %s2240_s11 }
 0x1eb   : > { %s4215_s21 = sld [smem:[#allocation29_spill]] }
 0x1f1   : > { %p2245_p6 = scmp.ne.s32.totalorder %s4215_s21, 0 }
 0x1f2   : > { %v967_v0 = vld [vmem:[%s747_s2] sm:$0xff] (!%p2245_p6)  ;;  %v969_v1 = vld [vmem:[#allocation6] sm:$0xff] (!%p2245_p6)  ;;  %vm971_vm0 = vcmask (!%p2245_p6), 261120  }
 0x1f3   : > { %966 = sbr.rel (%p2245_p6) target bundleno = 506 (0x1fa), region = 144  ;;  %v968_v2 = vmul.f32 (!%p2245_p6), 5.656854, %v967_v0 }
 0x1f5   : > { %v970_v3 = vadd.f32 (!%p2245_p6), %v969_v1, %v968_v2 }
 0x1f7   : > { %972 = vst.msk [vmem:[#allocation2] sm:$0xff] (!%p2245_p6), %vm971_vm0, %v970_v3 }
 0x1fa PF: > { %v2586_v4 = vld [vmem:[%s3864_s5] sm:$0xff]   ;;  %v3193_v5 = vmov 0.0   ;;  %v2587_v6 = vld [vmem:[%s3864_s5 + $0x8] sm:$0xff]   ;;  %vm3194_vm1 = vmmov 0   ;;  %vm1025_vm2 = vcmask 261120   ;;  %s3195_s11 = smov 112  }
 0x1fb   : > { %2336 = vmatprep.subr.bf16.mxu0 %v3193_v5  ;;  %2344 = vmatprep.subr.bf16.mxu1 %v3193_v5  ;;  %v2248_v9 = vld [vmem:[%s776_s24] ss:$0 sm:$0xff]  ;;  %s3196_s2 = smov 96   ;;  %s3197_s7 = smov 80   ;;  %vm1073_vm3 = vcmask 130048   ;;  %vm1128_vm4 = vcmask 64512  }
 0x1fc   : > { %2337 = vmatpush3.bf16.msra.mxu0 %v2586_v4  ;;  %2340 = vmatprep.mubr.msk.bf16.mxu0 %vm3194_vm1, %v3193_v5  ;;  %v2253_v22 = vld [vmem:[%s759_s10] ss:$0 sm:$0xff]  ;;  %s3198_s10 = smov 64   ;;  %s3199_s5 = smov 48   ;;  %vm1146_vm5 = vcmask 1043456   ;;  %v2588_v58 = vld [vmem:[%s3873_s12] sm:$0xff]  }
 0x1fd   : > { %2338 = vmatprep.subr.bf16.mxu0 %v3193_v5  ;;  %2346 = vmatprep.mubr.msk.bf16.mxu1 %vm3194_vm1, %v3193_v5  ;;  %v2589_v59 = vld [vmem:[%s3873_s12 + $0x8] sm:$0xff]   ;;  %s3200_s29 = smov 16   ;;  %vm1652_vm8 = vcmask 523264   ;;  %s4216_s25 = sld [smem:[#allocation29_spill]] }
 0x1fe   : > { %v3895_v7 = vld [vmem:[#allocation2] sm:$0xff] }
 0x1ff   : > { %v1001_v8 = vpack.c.bf16 %v3895_v7, %v3895_v7 }
 0x200   : > { %2339 = vmatpush3.bf16.msra.mxu0 %v2587_v6 }
 0x201   : > { %2350 = vmatprep.subr.bf16.mxu0 %v3193_v5 }
 0x203   : > { %2341 = vmatmul.mubr.msk.bf16.vlgmr.msra.gmra.mrb[0].mxu0 %vm1025_vm2, %v1001_v8  ;;  %p2291_p11 = scmp.ne.s32.totalorder %s4216_s25, 1 }
 0x204   : > { %2352 = vmatprep.mubr.msk.bf16.mxu0 %vm3194_vm1, %v3193_v5 }
 0x2d6   : > { %v1063_v10 = vpop.f32.mrb[0].mxu0 }
 0x2d7   : > { %v1064_v11 = vadd.f32 %v2248_v9, %v1063_v10  ;;  %v2342_v12 = vpop.f32.mrb[1].mxu0  ;;  %v2257_v9 = vld [vmem:[%s793_s3] ss:$0 sm:$0xff] }
 0x2d8   : > { %v1066_v13 = vpop.f32.mrb[2].mxu0 }
 0x2d9   : > { %v1069_v14 = vpack.c.bf16 %v1064_v11, %v1064_v11  ;;  %v2343_v15 = vpop.f32.mrb[3].mxu0 }
 0x2db   : > { %1190 = vrot.lane.b32.xlu1 %v1069_v14, %s3195_s11  ;;  %1071 = vrot.lane.b32.xlu0 %v1069_v14, %s3196_s2 }
 0x2df   : > { %1192 = vrot.lane.b32.xlu0 %v1069_v14, %s3197_s7 }
 0x34d   : > { %v1072_v16 = vpop.permute.xlu0 %1071  ;;  %v1191_v20 = vpop.permute.xlu1 %1190 }
 0x34e   : > { %v1078_v17 = vsel %vm1073_vm3, %v1072_v16, 0 }
 0x34f   : > { %2345 = vmatpush3.bf16.xpose.msra.mxu1 %v1078_v17 }
 0x350   : > { %2356 = vmatprep.subr.bf16.mxu1 %v3193_v5 }
 0x351   : > { %v1193_v18 = vpop.permute.xlu0 %1192 }
 0x352   : > { %v1198_v19 = vsel %vm1073_vm3, %v1193_v18, 0 }
 0x356   : > { %2347 = vmatmul.mubr.msk.bf16.vlgmr.msra.gmra.mrb[0].mxu1 %vm1073_vm3, %v1069_v14 }
 0x357   : > { %2357 = vmatpush3.bf16.xpose.msra.mxu1 %v1198_v19  ;;  %2358 = vmatprep.mubr.msk.bf16.mxu1 %vm3194_vm1, %v3193_v5 }
 0x358   : > { %2368 = vmatprep.subr.bf16.mxu1 %v3193_v5 }
 0x35e   : > { %2359 = vmatmul.mubr.msk.bf16.vlgmr.msra.gmra.mrb[4].mxu1 %vm1073_vm3, %v1191_v20 }
 0x35f   : > { %2372 = vmatprep.mubr.msk.bf16.mxu1 %vm3194_vm1, %v3193_v5  ;;  %2369 = vmatpush3.bf16.msra.mxu1 %v2588_v58 }
 0x360   : > { %2370 = vmatprep.subr.bf16.mxu1 %v3193_v5 }
 0x363   : > { %2371 = vmatpush3.bf16.msra.mxu1 %v2589_v59 }
 0x364   : > { %2384 = vmatprep.subr.bf16.mxu1 %v3193_v5 }
 0x429   : > { %v1114_v21 = vpop.f32.mrb[0].mxu1 }
 0x42a   : > { %v1120_v23 = vmul.f32 0.25, %v1114_v21  ;;  %v2348_v24 = vpop.f32.mrb[1].mxu1 }
 0x42b   : > { %v1117_v25 = vpop.f32.mrb[2].mxu1  ;;  %v2592_v24 = vld [vmem:[%s3878_s19 + $0x18] sm:$0xff]  }
 0x42c   : > { %v2349_v26 = vpop.f32.mrb[3].mxu1  ;;  %v1127_v27 = vadd.f32 %v2253_v22, %v1120_v23  ;;  %v2591_v23 = vld [vmem:[%s3878_s19] sm:$0xff]  }
 0x42e   : > { %v1129_v28 = vsel %vm1128_vm4, %v1127_v27, -inf }
 0x42f   : > { %1130 = vmax.xlane.f32.xlu1 %v1129_v28 }
 0x431   : > { %v1234_v29 = vpop.f32.mrb[4].mxu1 }
 0x432   : > { %v1240_v30 = vmul.f32 0.25, %v1234_v29  ;;  %v2360_v31 = vpop.f32.mrb[5].mxu1 }
 0x433   : > { %v1237_v32 = vpop.f32.mrb[6].mxu1 }
 0x434   : > { %v2361_v33 = vpop.f32.mrb[7].mxu1  ;;  %v1241_v34 = vadd.f32 %v2253_v22, %v1240_v30  ;;  %v2590_v22 = vld [vmem:[%s3878_s19 + $0x10] sm:$0xff]  }
 0x435   : > { %v2261_v33 = vld [vmem:[%s801_s18] ss:$0 sm:$0xff] }
 0x436   : > { %v1242_v35 = vsel %vm1128_vm4, %v1241_v34, -inf }
 0x437   : > { %1243 = vmax.xlane.f32.xlu0 %v1242_v35  ;;  %v2262_v35 = vld [vmem:[%s809_s13] ss:$0 sm:$0xff] }
 0x4bc   : > { %v1131_v36 = vpop.xlane.xlu1 %1130 }
 0x4bd   : > { %v1132_v37 = vsub.f32 %v1127_v27, %v1131_v36  ;;  %v975_v27 = vlaneseq }
 0x4bf   : > { %v1133_v38 = vmul.f32 1.442695, %v1132_v37  ;;  %v976_v29 = vshrl.u32 %v975_v27, 7 }
 0x4c1   : > { %2608 = vpow2.f32 %v1133_v38  ;;  %v981_v30 = vand.u32 7, %v976_v29 }
 0x4c3   : > { %v989_v31 = vadd.s32 4294967295, %v981_v30  ;;  %v995_v38 = vadd.s32 1, %v981_v30 }
 0x4c4   : > { %v1244_v39 = vpop.xlane.xlu0 %1243 }
 0x4c5   : > { %v1245_v40 = vsub.f32 %v1241_v34, %v1244_v39  ;;  %vm990_vm6 = vcmp.ge.s32.totalorder %v989_v31, 0  ;;  %vm997_vm7 = vcmp.lt.s32.totalorder %v995_v38, 8 }
 0x4c6   : > { %v3960_v39 = vsel %vm990_vm6, 1.0, %v3193_v5 }
 0x4c7   : > { %v1246_v41 = vmul.f32 1.442695, %v1245_v40 }
 0x4c9   : > { %2610 = vpow2.f32 %v1246_v41 }
 0x4cb   : > { %v2609_v42 = vpop.eup %2608 }
 0x4cc   : > { %v1135_v43 = vsel %vm1128_vm4, %v2609_v42, 0.0 }
 0x4cd   : > { %1136 = vadd.xlane.f32.xlu0 %v1135_v43  ;;  %v2594_v43 = vld [vmem:[%s3878_s19 + $0x20] sm:$0xff]  }
 0x4d3   : > { %v2611_v44 = vpop.eup %2610 }
 0x4d4   : > { %v1248_v45 = vsel %vm1128_vm4, %v2611_v44, 0.0 }
 0x4d5   : > { %1249 = vadd.xlane.f32.xlu1 %v1248_v45 }
 0x4e3   : > { %1141 = vrot.lane.b32.xlu0 %v1069_v14, %s3198_s10 }
 0x4e6   : > { %1254 = vrot.lane.b32.xlu1 %v1069_v14, %s3199_s5 }
 0x55a   : > { %v1137_v46 = vpop.xlane.xlu0 %1136 }
 0x55b   : > { %2612 = vrcp.f32 %v1137_v46  ;;  %v3972_v46 = vsel %vm997_vm7, 1.0, %v3193_v5 }
 0x55e   : > { %v1142_v47 = vpop.permute.xlu0 %1141 }
 0x55f   : > { %v1148_v48 = vsel %vm1146_vm5, %v1142_v47, 0  ;;  %v2595_v47 = vld [vmem:[%s3878_s19 + $0x28] sm:$0xff]  }
 0x560   : > { %2351 = vmatpush3.bf16.msra.mxu0 %v1148_v48 }
 0x561   : > { %2362 = vmatprep.subr.bf16.mxu0 %v3193_v5 }
 0x562   : > { %v1250_v49 = vpop.xlane.xlu1 %1249 }
 0x563   : > { %2614 = vrcp.f32 %v1250_v49 }
 0x565   : > { %v2613_v50 = vpop.eup %2612 }
 0x566   : > { %v1139_v51 = vmul.f32 %v2613_v50, %v2609_v42  ;;  %v1255_v52 = vpop.permute.xlu1 %1254  ;;  %v2596_v50 = vld [vmem:[%s3881_s14 + $0x20] sm:$0xff]  }
 0x567   : > { %v1260_v54 = vsel %vm1146_vm5, %v1255_v52, 0  ;;  %v2598_v52 = vld [vmem:[%s3881_s14 + $0x28] sm:$0xff]  }
 0x568   : > { %v1140_v53 = vpack.c.bf16 %v1139_v51, %v1139_v51  ;;  %v2597_v51 = vld [vmem:[%s3881_s14] sm:$0xff]  }
 0x56a   : > { %2353 = vmatmul.mubr.msk.bf16.vlgmr.msra.gmra.mrb[4].mxu0 %vm1128_vm4, %v1140_v53  ;;  %v2599_v53 = vld [vmem:[%s3881_s14 + $0x8] sm:$0xff]  }
 0x56b   : > { %2363 = vmatpush3.bf16.msra.mxu0 %v1260_v54  ;;  %2364 = vmatprep.mubr.msk.bf16.mxu0 %vm3194_vm1, %v3193_v5  ;;  %v2600_v54 = vld [vmem:[%s3881_s14 + $0x30] sm:$0xff]  }
 0x56c   : > { %2376 = vmatprep.subr.bf16.mxu0 %v3193_v5 }
 0x56d   : > { %v2615_v55 = vpop.eup %2614 }
 0x56e   : > { %v1252_v56 = vmul.f32 %v2615_v55, %v2611_v44  ;;  %v2601_v55 = vld [vmem:[%s3881_s14 + $0x10] sm:$0xff]  }
 0x570   : > { %v1253_v57 = vpack.c.bf16 %v1252_v56, %v1252_v56  ;;  %v2602_v56 = vld [vmem:[%s3881_s14 + $0x38] sm:$0xff]  }
 0x572   : > { %2365 = vmatmul.mubr.msk.bf16.vlgmr.msra.gmra.mrb[8].mxu0 %vm1128_vm4, %v1253_v57  ;;  %v2603_v57 = vld [vmem:[%s3881_s14 + $0x18] sm:$0xff]  }
 0x573   : > { %2380 = vmatprep.mubr.msk.bf16.mxu0 %vm3194_vm1, %v3193_v5  ;;  %2377 = vmatpush3.bf16.msra.mxu0 %v2591_v23 }
 0x574   : > { %2378 = vmatprep.subr.bf16.mxu0 %v3193_v5 }
 0x63d   : > { %v1184_v60 = vpop.f32.mrb[4].mxu0 }
 0x63e   : > { %v2354_v61 = vpop.f32.mrb[5].mxu0 }
 0x63f   : > { %v1187_v62 = vpop.f32.mrb[6].mxu0 }
 0x640   : > { %v2355_v63 = vpop.f32.mrb[7].mxu0 }
 0x645   : > { %v1296_v0 = vpop.f32.mrb[8].mxu0 }
 0x646   : > { %1303 = vrot.lane.b32.xlu1 %v1296_v0, %s3200_s29  ;;  %v2366_v1 = vpop.f32.mrb[9].mxu0 }
 0x647   : > { %v1299_v2 = vpop.f32.mrb[10].mxu0 }
 0x648   : > { %v2367_v3 = vpop.f32.mrb[11].mxu0 }
 0x649   : > { %v2272_v3 = vld [vmem:[%s826_s8] ss:$0 sm:$0xff] }
 0x6b8   : > { %v1304_v4 = vpop.permute.xlu1 %1303 }
 0x6b9   : > { %v1306_v6 = vsel %vm1073_vm3, %v1184_v60, %v1304_v4 }
 0x6ba   : > { %v1307_v8 = vpack.c.bf16 %v1306_v6, %v1306_v6 }
 0x6bc   : > { %2373 = vmatmul.mubr.msk.bf16.vlgmr.msra.gmra.mrb[8].mxu1 %vm1025_vm2, %v1307_v8 }
 0x6bd   : > { %2388 = vmatprep.mubr.msk.bf16.mxu1 %vm3194_vm1, %v3193_v5  ;;  %2385 = vmatpush3.bf16.msra.mxu1 %v2590_v22 }
 0x6be   : > { %2386 = vmatprep.subr.bf16.mxu1 %v3193_v5 }
 0x6c1   : > { %2387 = vmatpush3.bf16.msra.mxu1 %v2592_v24 }
 0x6c2   : > { %2400 = vmatprep.subr.bf16.mxu1 %v3193_v5 }
 0x78f   : > { %v1368_v10 = vpop.f32.mrb[8].mxu1 }
 0x790   : > { %v1369_v11 = vadd.f32 %v2257_v9, %v1368_v10  ;;  %v2374_v12 = vpop.f32.mrb[9].mxu1 }
 0x791   : > { %v1371_v13 = vpop.f32.mrb[10].mxu1 }
 0x792   : > { %v2375_v14 = vpop.f32.mrb[11].mxu1  ;;  %v1374_v15 = vadd.f32 %v1369_v11, %v3895_v7  ;;  %v2593_v7 = vld [vmem:[%s3878_s19 + $0x8] sm:$0xff]  }
 0x793   : > { %2379 = vmatpush3.bf16.msra.mxu0 %v2593_v7 }
 0x794   : > { %v1377_v16 = vsel %vm1025_vm2, %v1374_v15, 0.0  ;;  %2392 = vmatprep.subr.bf16.mxu0 %v3193_v5 }
 0x795   : > { %1378 = vadd.xlane.f32.xlu0 %v1377_v16  ;;  %v2604_v16 = vld [vmem:[%s3881_s14 + $0x40] sm:$0xff]  }
 0x822   : > { %v1379_v17 = vpop.xlane.xlu0 %1378 }
 0x823   : > { %v1381_v18 = vmul.f32 0.03125, %v1379_v17 }
 0x825   : > { %v1382_v19 = vsub.f32 %v1374_v15, %v1381_v18  ;;  %v2605_v18 = vld [vmem:[%s3881_s14 + $0x48] sm:$0xff]  }
 0x827   : > { %v1383_v20 = vmul.f32 %v1382_v19, %v1382_v19 }
 0x829   : > { %v1384_v21 = vsel %vm1025_vm2, %v1383_v20, 0.0 }
 0x82a   : > { %1385 = vadd.xlane.f32.xlu1 %v1384_v21  ;;  %v2607_v21 = vld [vmem:[%s3881_s14 + $0x58] sm:$0xff]  }
 0x8b7   : > { %v1386_v25 = vpop.xlane.xlu1 %1385 }
 0x8b8   : > { %v1387_v26 = vmul.f32 0.03125, %v1386_v25 }
 0x8ba   : > { %v1388_v28 = vadd.f32 1e-05, %v1387_v26 }
 0x8bc   : > { %2616 = vrsqrt.f32 %v1388_v28 }
 0x8c6   : > { %v2617_v32 = vpop.eup %2616 }
 0x8c7   : > { %v1390_v34 = vmul.f32 %v2617_v32, %v1382_v19  ;;  %v2606_v19 = vld [vmem:[%s3881_s14 + $0x50] sm:$0xff]  }
 0x8c8   : > { %v2288_v32 = vld [vmem:[%s843_s1] ss:$0 sm:$0xff] }
 0x8c9   : > { %v1397_v36 = vmul.f32 %v2261_v33, %v1390_v34 }
 0x8cb   : > { %v3957_v37 = vadd.f32 %v2262_v35, %v1397_v36 }
 0x8cd   : > { %v1418_v40 = vpack.c.bf16 %v3957_v37, %v3957_v37  ;;  %v1419_v41 = vrot.slane %v3957_v37, 7  ;;  %v1532_v45 = vrot.slane %v3957_v37, 1 }
 0x8cf   : > { %2389 = vmatmul.mubr.msk.bf16.vlgmr.msra.gmra.mrb[12].mxu1 %vm1025_vm2, %v1418_v40  ;;  %v1420_v42 = vmul.f32 %v3960_v39, %v1419_v41  ;;  %v1533_v48 = vmul.f32 %v3972_v46, %v1532_v45 }
 0x8d0   : > { %2408 = vmatprep.mubr.msk.bf16.mxu1 %vm3194_vm1, %v3193_v5  ;;  %2401 = vmatpush3.bf16.msra.mxu1 %v2597_v51 }
 0x8d1   : > { %v1421_v44 = vpack.c.bf16 %v1420_v42, %v1420_v42  ;;  %v1534_v49 = vpack.c.bf16 %v1533_v48, %v1533_v48  ;;  %2402 = vmatprep.subr.bf16.mxu1 %v3193_v5 }
 0x8d3   : > { %2381 = vmatmul.mubr.msk.bf16.vlgmr.msra.gmra.mrb[12].mxu0 %vm1025_vm2, %v1421_v44 }
 0x8d4   : > { %2393 = vmatpush3.bf16.msra.mxu0 %v2594_v43  ;;  %2396 = vmatprep.mubr.msk.bf16.mxu0 %vm3194_vm1, %v3193_v5 }
 0x8d5   : > { %2394 = vmatprep.subr.bf16.mxu0 %v3193_v5  ;;  %2403 = vmatpush3.bf16.msra.mxu1 %v2599_v53 }
 0x8d6   : > { %2404 = vmatprep.subr.bf16.mxu1 %v3193_v5 }
 0x8d8   : > { %2395 = vmatpush3.bf16.msra.mxu0 %v2595_v47 }
 0x8d9   : > { %2412 = vmatprep.subr.bf16.mxu0 %v3193_v5  ;;  %2405 = vmatpush3.bf16.msra.mxu1 %v2601_v55 }
 0x8da   : > { %2406 = vmatprep.subr.bf16.mxu1 %v3193_v5 }
 0x8db   : > { %2397 = vmatmul.mubr.msk.bf16.vlgmr.msra.gmra.mrb[16].mxu0 %vm1025_vm2, %v1534_v49 }
 0x8dc   : > { %2420 = vmatprep.mubr.msk.bf16.mxu0 %vm3194_vm1, %v3193_v5  ;;  %2413 = vmatpush3.bf16.msra.mxu0 %v2596_v50  ;;  %v2289_v50 = vld [vmem:[%s851_s6] ss:$0 sm:$0xff] }
 0x8dd   : > { %2414 = vmatprep.subr.bf16.mxu0 %v3193_v5  ;;  %2407 = vmatpush3.bf16.msra.mxu1 %v2603_v57 }
 0x8de   : > { %2424 = vmatprep.subr.bf16.mxu1 %v3193_v5 }
 0x8e0   : > { %2415 = vmatpush3.bf16.msra.mxu0 %v2598_v52 }
 0x8e1   : > { %2416 = vmatprep.subr.bf16.mxu0 %v3193_v5 }
 0x8e4   : > { %2417 = vmatpush3.bf16.msra.mxu0 %v2600_v54 }
 0x8e5   : > { %2418 = vmatprep.subr.bf16.mxu0 %v3193_v5 }
 0x8e8   : > { %2419 = vmatpush3.bf16.msra.mxu0 %v2602_v56 }
 0x9a2   : > { %v1526_v58 = vpop.f32.mrb[12].mxu1 }
 0x9a3   : > { %v2390_v59 = vpop.f32.mrb[13].mxu1 }
 0x9a4   : > { %v1529_v60 = vpop.f32.mrb[14].mxu1 }
 0x9a5   : > { %v2391_v61 = vpop.f32.mrb[15].mxu1 }
 0x9a6   : > { %v1471_v62 = vpop.f32.mrb[12].mxu0 }
 0x9a7   : > { %v1527_v63 = vadd.f32 %v1526_v58, %v1471_v62  ;;  %v2382_v0 = vpop.f32.mrb[13].mxu0 }
 0x9a8   : > { %v1474_v1 = vpop.f32.mrb[14].mxu0 }
 0x9a9   : > { %v2383_v2 = vpop.f32.mrb[15].mxu0 }
 0x9ae   : > { %v1584_v4 = vpop.f32.mrb[16].mxu0 }
 0x9af   : > { %v1590_v6 = vadd.f32 %v1584_v4, %v1527_v63  ;;  %v2398_v8 = vpop.f32.mrb[17].mxu0 }
 0x9b0   : > { %v1587_v9 = vpop.f32.mrb[18].mxu0 }
 0x9b1   : > { %v1597_v10 = vadd.f32 %v2272_v3, %v1590_v6  ;;  %v2399_v11 = vpop.f32.mrb[19].mxu0 }
 0x9b3   : > { %v1598_v12 = vmax.f32 %v1597_v10, 0.0 }
 0x9b5   : > { %v1624_v13 = vpack.c.bf16 %v1598_v12, %v1598_v12  ;;  %v1625_v14 = vrot.slane %v1598_v12, 7  ;;  %v1763_v20 = vrot.slane %v1598_v12, 1 }
 0x9b7   : > { %v1626_v15 = vmul.f32 %v3960_v39, %v1625_v14  ;;  %2421 = vmatmul.mubr.msk.bf16.vlgmr.msra.gmra.mrb[20].mxu0 %vm1652_vm8, %v1624_v13  ;;  %v1764_v22 = vmul.f32 %v3972_v46, %v1763_v20 }
 0x9b9   : > { %v1627_v17 = vpack.c.bf16 %v1626_v15, %v1626_v15  ;;  %v1765_v23 = vpack.c.bf16 %v1764_v22, %v1764_v22 }
 0x9bb   : > { %2409 = vmatmul.mubr.msk.bf16.vlgmr.msra.gmra.mrb[16].mxu1 %vm1652_vm8, %v1627_v17 }
 0x9bc   : > { %2425 = vmatpush3.bf16.msra.mxu1 %v2604_v16  ;;  %2432 = vmatprep.mubr.msk.bf16.mxu1 %vm3194_vm1, %v3193_v5 }
 0x9bd   : > { %2426 = vmatprep.subr.bf16.mxu1 %v3193_v5 }
 0x9c0   : > { %2427 = vmatpush3.bf16.msra.mxu1 %v2605_v18 }
 0x9c1   : > { %2428 = vmatprep.subr.bf16.mxu1 %v3193_v5 }
 0x9c4   : > { %2429 = vmatpush3.bf16.msra.mxu1 %v2606_v19 }
 0x9c5   : > { %2430 = vmatprep.subr.bf16.mxu1 %v3193_v5 }
 0x9c8   : > { %2431 = vmatpush3.bf16.msra.mxu1 %v2607_v21 }
 0x9cb   : > { %2433 = vmatmul.mubr.msk.bf16.vlgmr.msra.gmra.mrb[20].mxu1 %vm1652_vm8, %v1765_v23 }
 0xa8a   : > { %v1757_v24 = vpop.f32.mrb[20].mxu0 }
 0xa8b   : > { %v2422_v7 = vpop.f32.mrb[21].mxu0 }
 0xa8c   : > { %v1760_v25 = vpop.f32.mrb[22].mxu0 }
 0xa8d   : > { %v2423_v26 = vpop.f32.mrb[23].mxu0 }
 0xa8e   : > { %v1690_v27 = vpop.f32.mrb[16].mxu1 }
 0xa8f   : > { %v1758_v28 = vadd.f32 %v1757_v24, %v1690_v27  ;;  %v2410_v29 = vpop.f32.mrb[17].mxu1 }
 0xa90   : > { %v1693_v30 = vpop.f32.mrb[18].mxu1 }
 0xa91   : > { %v2411_v31 = vpop.f32.mrb[19].mxu1 }
 0xa9e   : > { %v1827_v33 = vpop.f32.mrb[20].mxu1 }
 0xa9f   : > { %v1833_v34 = vadd.f32 %v1827_v33, %v1758_v28  ;;  %v2434_v35 = vpop.f32.mrb[21].mxu1 }
 0xaa0   : > { %v1830_v36 = vpop.f32.mrb[22].mxu1 }
 0xaa1   : > { %v1840_v5 = vadd.f32 %v2288_v32, %v1833_v34  ;;  %v2435_v38 = vpop.f32.mrb[23].mxu1 }
 0xaa3   : > { %v1841_v39 = vadd.f32 %v1840_v5, %v3957_v37  ;;  %v2290_v37 = vld [vmem:[%s859_s28] ss:$0 sm:$0xff] }
 0xaa5   : > { %v1844_v40 = vsel %vm1025_vm2, %v1841_v39, 0.0 }
 0xaa6   : > { %1845 = vadd.xlane.f32.xlu0 %v1844_v40 }
 0xb33   : > { %v1846_v41 = vpop.xlane.xlu0 %1845 }
 0xb34   : > { %v1847_v42 = vmul.f32 0.03125, %v1846_v41 }
 0xb36   : > { %v1848_v43 = vsub.f32 %v1841_v39, %v1847_v42 }
 0xb38   : > { %v1849_v44 = vmul.f32 %v1848_v43, %v1848_v43 }
 0xb3a   : > { %v1850_v45 = vsel %vm1025_vm2, %v1849_v44, 0.0 }
 0xb3b   : > { %1851 = vadd.xlane.f32.xlu0 %v1850_v45 }
 0xbc8   : > { %v1852_v46 = vpop.xlane.xlu0 %1851 }
 0xbc9   : > { %v1853_v47 = vmul.f32 0.03125, %v1852_v46 }
 0xbcb   : > { %v1854_v48 = vadd.f32 1e-05, %v1853_v47 }
 0xbcd   : > { %2618 = vrsqrt.f32 %v1854_v48 }
 0xbd7   : > { %v2619_v49 = vpop.eup %2618 }
 0xbd8   : > { %v1856_v51 = vmul.f32 %v2619_v49, %v1848_v43  ;;  %1875 = sbr.rel (%p2291_p11) target bundleno = 3039 (0xbdf), region = 148 }
 0xbda   : > { %v1863_v52 = vmul.f32 %v2289_v50, %v1856_v51 }
 0xbdc   : > { %v1870_v53 = vadd.f32 %v2290_v37, %v1863_v52 }
 0xbde   : > { %1871 = vst.msk [vmem:[#allocation2] sm:$0xff] %vm1025_vm2, %v1870_v53  ;;  %1876 = vst.msk [vmem:[%s3886_s15] sm:$0xff] (!%p2291_p11), %vm1025_vm2, %v1870_v53 }
 0xbdf PF: > { %s4217_s24 = sld [smem:[#allocation30_spill]]  ;;  %s4218_s12 = sld [smem:[#allocation38_spill]] }
 0xbe0   : > { %s4219_s17 = sld [smem:[#allocation55_spill]]  ;;  %s1891_s8 = sshll.u32 %s3886_s15, 4  ;;  %s1892_s8 = int_to_ptr.vmem [resolvable:$true] %s1891_s8 }
 0xbe1   : > { %s1878_s14 = scalar_lea.sflag [#allocation5], %s3844_s30  ;;  %s3040_s1 = scalar_lea.vmem %s1892_s8, 128 }
 0xbe2   : > { %p3041_p1 = scmp.ne.s32.totalorder %s1892_s8, %s3040_s1  ;;  %s3201_s6 = smov [#allocation21]  }
 0xbe3   : > { %s3044_s28 = sshll.u32 %s3201_s6, 4  ;;  %s3045_s28 = int_to_ptr.vmem [resolvable:$false] %s3044_s28 }
 0xbe4   : > { %s3046_s21 = scalar_lea.vmem %s3045_s28, 256  ;;  %p3047_p9 = scmp.lt.s32.totalorder %s1892_s8, %s3045_s28 }
 0xbe5   : > { %s2293_s3 = sshll.u32 %s4217_s24, 7  ;;  %p4220_p5 = scmp.ne.s32.totalorder %s4218_s12, 0 }
 0xbe6   : > { %s4032_s19 = scalar_lea.hbm %s4219_s17, %s2293_s3  ;;  %p3048_p3 = scmp.lt.s32.totalorder %s3046_s21, %s3040_s1 }
 0xbe7   : > { %p3042_p8 = pnand %p3041_p1, %p4220_p5 }
 0xbe8   : > { %p3049_p4 = por %p3048_p3, %p3047_p9 }
 0xbe9   : > { %p3043_p2 = pneg %p3042_p8 }
 0xbeb   : > { %p3050_p12 = pnand %p3049_p4, %p3043_p2 }
 0xbed   : > { %3053 = shalt.err (!%p3050_p12)
}
 0xbee   : > { %s3054_s30 = scalar_lea.hbm %s4032_s19, 128  ;;  %s3058_s2 = scalar_lea.hbm %s4219_s17, 256 }
 0xbef   : > { %p3055_p13 = scmp.ne.s32.totalorder %s4032_s19, %s3054_s30  ;;  %p3059_p0 = scmp.lt.u32.totalorder %s4032_s19, %s4219_s17 }
 0xbf0   : > { %p3060_p6 = scmp.lt.u32.totalorder %s3058_s2, %s3054_s30  ;;  %p3062_p1 = scmp.lt.u32.totalorder %s3054_s30, %s4032_s19 }
 0xbf1   : > { %p3056_p7 = pnand %p3055_p13, %p4220_p5 }
 0xbf2   : > { %p3061_p11 = por %p3060_p6, %p3059_p0 }
 0xbf3   : > { %p3057_p10 = pneg %p3056_p7 }
 0xbf4   : > { %p3063_p8 = por %p3062_p1, %p3061_p11 }
 0xbf6   : > { %p3064_p2 = pnand %p3063_p8, %p3057_p10 }
 0xbf8   : > { %3067 = shalt.err (!%p3064_p2)
}
 0xbf9   : > { %2474 = dma.vmem_to_hbm [thread:$0]  (%p4220_p5), %s1892_s8, 128, %s4032_s19, %s1878_s14  }
 0xbfa PF: > { %s4221_s5 = sld [smem:[#allocation31_spill]]  ;;  %s4222_s29 = sld [smem:[#allocation28_spill]] }
 0xbfb   : > { %s4223_s25 = sld [smem:[#allocation39_spill]] }
 0xc00   : > { %p2486_p9 = scmp.ge.s32.totalorder %s4221_s5, 2  ;;  %s1903_s24 = sand.u32 1, %s4222_s29  }
 0xc01   : > { %p4224_p3 = scmp.ne.s32.totalorder %s4223_s25, 0  ;;  %s1904_s3 = scalar_lea.sflag [#allocation5], %s1903_s24 }
 0xc03   : > { %p2481_p4 = pnand %p2486_p9, %p4224_p3 }
 0xc05   : > { %3129 = dma.done.wait (!%p2481_p4), %s1904_s3, 128  }
 0xc06   : > { %3131 = vsyncadd (!%p2481_p4), %s1904_s3, 4294967168  ;;  %s32_s28 = sadd.s32 1, %s4221_s5   ;;  %s4225_s18 = sld [smem:[#allocation27_spill]] }
 0xc07   : > { %p29_p12 = scmp.ge.s32.totalorder %s32_s28, 6   ;;  %s4226_s13 = sld [smem:[#allocation35_spill]] }
 0xc08   : > { %s4227_s12 = sld [smem:[#allocation36_spill]]  ;;  %s4228_s8 = sld [smem:[#allocation32_spill]] }
 0xc09   : > { %s4229_s14 = sld [smem:[#allocation33_spill]]  ;;  %s4230_s19 = smov %s3142_s20 }
 0xc0a   : > { %s4232_s21 = smov %s3150_s22  ;;  %s4233_s22 = smov %s3154_s23 }
 0xc0b   : > { %s4235_s24 = smov %s3166_s26  ;;  %s4236_s25 = smov %s3170_s27 }
 0xc0c   :  { %31 = sbr.rel (!%p29_p12) target bundleno = 27 (0x1b), region = 280 }
 0xc0d   : > { %s4231_s20 = smov %s4226_s13 }
 0xc0e   : > { %s4234_s23 = smov %s4227_s12  ;;  %s4237_s26 = smov %s4228_s8 }
 0xc0f   : > { %s4238_s27 = smov %s4229_s14 }
 0xc13   :  { %1909 = vsyncpa [#allocation4], 1 }
 0xc14   :  { %1911 = vsyncpa [#allocation4 + $0x1], 1 }
 0xc15   :  { %1912 = vsyncpa [#allocation7], 1 }
 0xc16   :  { %1913 = vsyncpa [#allocation5], 1 }
 0xc17   :  { %1915 = vsyncpa [#allocation5 + $0x1], 1 }

</bundles_post_ra>
